<compile_context>
chip_gen: v7x
topology: tpu7x:2x2x1
jax: 0.10.0
libtpu: 0.0.40
codegen_flags: <defaults>
</compile_context>

<pallas_src>
import functools

import jax
import jax.numpy as jnp
import numpy as np
from jax.experimental import pallas as pl
from jax.experimental.pallas import tpu as pltpu


def _round_up(x, m):
    return ((x + m - 1) // m) * m


def _softsign(x):
    # EUP reciprocal (approx) keeps the divide off the VPU slot.
    return x * pl.reciprocal(1.0 + jnp.abs(x), approx=True)


def _sigmoid(x):
    # exact identity sigmoid(x) = 0.5 * (1 + tanh(x/2)); tanh runs on the EUP.
    return 0.5 * (1.0 + jnp.tanh(0.5 * x))


def potentialnet_propagation_kernel(
        adj_ref, h0_ref,
        wih_ref, whh_ref, bih_ref, bhh_ref,      # packed GRU weights [Fp,3Fp] / biases [1,3Fp]
        wi1a_ref, wi1b_ref, bi1_ref,             # attention net_i layer 1 (split for the concat)
        wi2_ref, bi2_ref,                        # attention net_i layer 2
        wj_ref, bj_ref,                          # attention net_j
        gmask_ref,                               # [1, Gp]: 1.0 on real gather cols, 0.0 on pad
        out_ref, *, k, fp):
    # Hoist all loop-invariant loads / casts out of the unrolled k-loop.
    adj = adj_ref[...].astype(jnp.float32)   # bf16 in HBM (exact integer counts) -> f32 math
    h0 = h0_ref[...]
    wih = wih_ref[...]
    whh = whh_ref[...]
    bih = bih_ref[...]
    bhh = bhh_ref[...]

    h = h0
    # --- GatedGraphConv: k rounds of (neighbor-sum -> shared GRUCell) ---
    for _ in range(k):
        m = jnp.dot(adj, h, preferred_element_type=jnp.float32)
        # two fused [N,Fp]@[Fp,3Fp] matmuls instead of six [N,Fp]@[Fp,Fp] ones
        gi = jnp.dot(m, wih, preferred_element_type=jnp.float32) + bih
        gh = jnp.dot(h, whh, preferred_element_type=jnp.float32) + bhh
        # fp is a multiple of 128, so these gate slices are lane-tile aligned (free)
        r = _sigmoid(gi[:, 0 * fp:1 * fp] + gh[:, 0 * fp:1 * fp])
        z = _sigmoid(gi[:, 1 * fp:2 * fp] + gh[:, 1 * fp:2 * fp])
        n = jnp.tanh(gi[:, 2 * fp:3 * fp] + r * gh[:, 2 * fp:3 * fp])
        h = n + z * (h - n)

    # --- PotentialNetAttention: softmax(net_i([h, h0]), dim=1) * net_j(h0) ---
    # cat([h, h0]) @ Wi1.T == h @ Wi1[:, :F].T + h0 @ Wi1[:, F:].T
    t = _softsign(jnp.dot(h, wi1a_ref[...], preferred_element_type=jnp.float32)
                  + jnp.dot(h0, wi1b_ref[...], preferred_element_type=jnp.float32)
                  + bi1_ref[...])
    a = _softsign(jnp.dot(t, wi2_ref[...], preferred_element_type=jnp.float32) + bi2_ref[...])
    # softsign bounds a to (-1, 1): no max-subtraction needed.  Mask out padded
    # gather columns so they do not contribute to the softmax denominator.
    e = jnp.exp(a) * gmask_ref[...]
    denom = jnp.sum(e, axis=1, keepdims=True)
    attn = e * pl.reciprocal(denom, approx=True)

    b = _softsign(jnp.dot(h0, wj_ref[...], preferred_element_type=jnp.float32) + bj_ref[...])
    out_ref[...] = attn * b


def potentialnet_propagation(data, edge_index, edge_attr, params, *, k):
    """data: [N, F] f32, edge_index: [2, E] i32, edge_attr: [E, 1] f32 (unused)."""
    del edge_attr  # dead code in the PyTorch forward path (never influences output)
    N, F = data.shape
    G = params["wj"].shape[0]

    # lane-dense padding: feature / gather widths up to 128 lanes, nodes to a sublane multiple
    FP = _round_up(F, 128)
    GP = _round_up(G, 128)
    NP = _round_up(N, 8)

    src, dst = edge_index[0], edge_index[1]
    # dense adjacency with edge multiplicities: m = adj @ h reproduces scatter_add.
    # bf16 is exact for small integer counts -> halves the largest operand's traffic.
    adj = (jnp.zeros((NP, NP), jnp.float32).at[dst, src].add(1.0)).astype(jnp.bfloat16)

    h0 = jnp.zeros((NP, FP), jnp.float32).at[:N, :F].set(data.astype(jnp.float32))

    w_ih, w_hh = params["w_ih"], params["w_hh"]
    b_ih, b_hh = params["b_ih"], params["b_hh"]

    def pack_gru_w(w):
        # PyTorch GRUCell weight [3F, F] (row blocks r, z, n) -> [FP, 3*FP] pre-transposed;
        # column block g holds w[g*F:(g+1)*F].T in its top-left corner, zeros elsewhere.
        packed = jnp.zeros((FP, 3 * FP), jnp.float32)
        for g in range(3):
            packed = packed.at[:F, g * FP:g * FP + F].set(w[g * F:(g + 1) * F, :].T)
        return packed

    def pack_gru_b(bvec):
        packed = jnp.zeros((1, 3 * FP), jnp.float32)
        for g in range(3):
            packed = packed.at[0, g * FP:g * FP + F].set(bvec[g * F:(g + 1) * F])
        return packed

    def pad2(mat, rows, cols):
        out = jnp.zeros((rows, cols), jnp.float32)
        return out.at[:mat.shape[0], :mat.shape[1]].set(mat)

    wi1, bi1 = params["wi1"], params["bi1"]
    wi2, bi2 = params["wi2"], params["bi2"]
    wj, bj = params["wj"], params["bj"]

    operands = [
        adj, h0,
        pack_gru_w(w_ih), pack_gru_w(w_hh), pack_gru_b(b_ih), pack_gru_b(b_hh),
        pad2(wi1[:, :F].T, FP, FP), pad2(wi1[:, F:].T, FP, FP), pad2(bi1[None, :], 1, FP),
        pad2(wi2.T, FP, GP), pad2(bi2[None, :], 1, GP),
        pad2(wj.T, FP, GP), pad2(bj[None, :], 1, GP),
        pad2(jnp.ones((1, G), jnp.float32), 1, GP),   # gather-column mask
    ]

    def full_spec(shape):
        nd = len(shape)
        return pl.BlockSpec(shape, lambda i, _nd=nd: (0,) * _nd)

    out_full = pl.pallas_call(
        functools.partial(potentialnet_propagation_kernel, k=k, fp=FP),
        grid=(1,),
        in_specs=[full_spec(x.shape) for x in operands],
        out_specs=full_spec((NP, GP)),
        out_shape=jax.ShapeDtypeStruct((NP, GP), jnp.float32),
        compiler_params=pltpu.CompilerParams(
            dimension_semantics=("arbitrary",),
            vmem_limit_bytes=48 * 1024 * 1024,   # explicit VMEM budget (safe on v5e/v6e/v7x)
        ),
    )(*operands)

    return out_full[:N, :G]


def reference_forward(data, edge_index, params, *, k):
    """Pure-JAX reference replicating the PyTorch forward semantics."""
    N, F = data.shape
    src, dst = edge_index[0], edge_index[1]
    adj = jnp.zeros((N, N), jnp.float32).at[dst, src].add(1.0)

    def softsign(x):
        return x / (1.0 + jnp.abs(x))

    h0 = data
    h = h0
    w_ih, w_hh, b_ih, b_hh = params["w_ih"], params["w_hh"], params["b_ih"], params["b_hh"]
    for _ in range(k):
        m = adj @ h
        gi = m @ w_ih.T + b_ih
        gh = h @ w_hh.T + b_hh
        r = jax.nn.sigmoid(gi[:, :F] + gh[:, :F])
        z = jax.nn.sigmoid(gi[:, F:2 * F] + gh[:, F:2 * F])
        n = jnp.tanh(gi[:, 2 * F:] + r * gh[:, 2 * F:])
        h = (1.0 - z) * n + z * h

    cat = jnp.concatenate([h, h0], axis=1)
    t = softsign(cat @ params["wi1"].T + params["bi1"])
    a = softsign(t @ params["wi2"].T + params["bi2"])
    a = jax.nn.softmax(a, axis=1)
    b = softsign(h0 @ params["wj"].T + params["bj"])
    return a * b


def make_params(key, feat_size, gather_width):
    F, G = feat_size, gather_width
    ks = jax.random.split(key, 10)
    s = 1.0 / np.sqrt(F)

    def u(k, shape, scale):
        return jax.random.uniform(k, shape, jnp.float32, -scale, scale)

    return {
        # GRUCell(F, F): weight_ih/[hh] are [3F, F], row blocks ordered (r, z, n)
        "w_ih": u(ks[0], (3 * F, F), s),
        "w_hh": u(ks[1], (3 * F, F), s),
        "b_ih": u(ks[2], (3 * F,), s),
        "b_hh": u(ks[3], (3 * F,), s),
        # attention net_i: Linear(2F, F) -> Softsign -> Linear(F, G) -> Softsign
        "wi1": u(ks[4], (F, 2 * F), 1.0 / np.sqrt(2 * F)),
        "bi1": u(ks[5], (F,), 1.0 / np.sqrt(2 * F)),
        "wi2": u(ks[6], (G, F), s),
        "bi2": u(ks[7], (G,), s),
        # attention net_j: Linear(F, G) -> Softsign
        "wj": u(ks[8], (G, F), s),
        "bj": u(ks[9], (G,), s),
    }


if __name__ == "__main__":
    FEAT_SIZE = 19      # module default
    GATHER_WIDTH = 64   # module default
    K = 2               # module default
    N_NODES = 16
    N_EDGES = 48

    root = jax.random.PRNGKey(0)
    k_data, k_edge, k_attr, k_param = jax.random.split(root, 4)

    data = jax.random.normal(k_data, (N_NODES, FEAT_SIZE), jnp.float32)
    edge_index = jax.random.randint(k_edge, (2, N_EDGES), 0, N_NODES, jnp.int32)
    edge_attr = jax.random.normal(k_attr, (N_EDGES, 1), jnp.float32)  # unused (dead path)
    params = make_params(k_param, FEAT_SIZE, GATHER_WIDTH)

    out = potentialnet_propagation(data, edge_index, edge_attr, params, k=K)
    out = jax.block_until_ready(out)

    ref = jax.block_until_ready(reference_forward(data, edge_index, params, k=K))

    assert out.shape == (N_NODES, GATHER_WIDTH)
    assert np.all(np.isfinite(np.asarray(out)))
    assert np.allclose(np.asarray(out), np.asarray(ref), atol=2e-3, rtol=1e-2), (
        "Pallas kernel output does not match pure-JAX reference")

    print("KERNEL_OK")
</pallas_src>

<mosaic_0001>
module attributes {stable_mosaic.version = 11 : i64} {
  func.func @potentialnet_propagation_kernel(%arg0: i32, %arg1: memref<16x16xbf16, #tpu.memory_space<vmem>>, %arg2: memref<16x128xf32, #tpu.memory_space<vmem>>, %arg3: memref<128x384xf32, #tpu.memory_space<vmem>>, %arg4: memref<128x384xf32, #tpu.memory_space<vmem>>, %arg5: memref<1x384xf32, #tpu.memory_space<vmem>>, %arg6: memref<1x384xf32, #tpu.memory_space<vmem>>, %arg7: memref<128x128xf32, #tpu.memory_space<vmem>>, %arg8: memref<128x128xf32, #tpu.memory_space<vmem>>, %arg9: memref<1x128xf32, #tpu.memory_space<vmem>>, %arg10: memref<128x128xf32, #tpu.memory_space<vmem>>, %arg11: memref<1x128xf32, #tpu.memory_space<vmem>>, %arg12: memref<128x128xf32, #tpu.memory_space<vmem>>, %arg13: memref<1x128xf32, #tpu.memory_space<vmem>>, %arg14: memref<1x128xf32, #tpu.memory_space<vmem>>, %arg15: memref<16x128xf32, #tpu.memory_space<vmem>>) attributes {dimension_semantics = [#tpu.dimension_semantics<arbitrary>], iteration_bounds = array<i64: 1>, scalar_prefetch = 0 : i64, scratch_operands = 0 : i64, tpu.core_type = #tpu.core_type<tc>, window_params = [{pipeline_mode = #tpu.pipeline_mode<synchronous>, transform_indices = @transform_0, window_bounds = array<i64: 16, 16>}, {pipeline_mode = #tpu.pipeline_mode<synchronous>, transform_indices = @transform_1, window_bounds = array<i64: 16, 128>}, {pipeline_mode = #tpu.pipeline_mode<synchronous>, transform_indices = @transform_2, window_bounds = array<i64: 128, 384>}, {pipeline_mode = #tpu.pipeline_mode<synchronous>, transform_indices = @transform_3, window_bounds = array<i64: 128, 384>}, {pipeline_mode = #tpu.pipeline_mode<synchronous>, transform_indices = @transform_4, window_bounds = array<i64: 1, 384>}, {pipeline_mode = #tpu.pipeline_mode<synchronous>, transform_indices = @transform_5, window_bounds = array<i64: 1, 384>}, {pipeline_mode = #tpu.pipeline_mode<synchronous>, transform_indices = @transform_6, window_bounds = array<i64: 128, 128>}, {pipeline_mode = #tpu.pipeline_mode<synchronous>, transform_indices = @transform_7, window_bounds = array<i64: 128, 128>}, {pipeline_mode = #tpu.pipeline_mode<synchronous>, transform_indices = @transform_8, window_bounds = array<i64: 1, 128>}, {pipeline_mode = #tpu.pipeline_mode<synchronous>, transform_indices = @transform_9, window_bounds = array<i64: 128, 128>}, {pipeline_mode = #tpu.pipeline_mode<synchronous>, transform_indices = @transform_10, window_bounds = array<i64: 1, 128>}, {pipeline_mode = #tpu.pipeline_mode<synchronous>, transform_indices = @transform_11, window_bounds = array<i64: 128, 128>}, {pipeline_mode = #tpu.pipeline_mode<synchronous>, transform_indices = @transform_12, window_bounds = array<i64: 1, 128>}, {pipeline_mode = #tpu.pipeline_mode<synchronous>, transform_indices = @transform_13, window_bounds = array<i64: 1, 128>}, {pipeline_mode = #tpu.pipeline_mode<synchronous>, transform_indices = @transform_14, window_bounds = array<i64: 16, 128>}]} {
    %c0 = arith.constant 0 : index
    %c0_0 = arith.constant 0 : index
    %0 = vector.load %arg1[%c0, %c0_0] : memref<16x16xbf16, #tpu.memory_space<vmem>>, vector<16x16xbf16>
    %1 = arith.extf %0 : vector<16x16xbf16> to vector<16x16xf32>
    %c0_1 = arith.constant 0 : index
    %c0_2 = arith.constant 0 : index
    %2 = vector.load %arg2[%c0_1, %c0_2] : memref<16x128xf32, #tpu.memory_space<vmem>>, vector<16x128xf32>
    %c0_3 = arith.constant 0 : index
    %c0_4 = arith.constant 0 : index
    %3 = vector.load %arg3[%c0_3, %c0_4] : memref<128x384xf32, #tpu.memory_space<vmem>>, vector<128x384xf32>
    %c0_5 = arith.constant 0 : index
    %c0_6 = arith.constant 0 : index
    %4 = vector.load %arg4[%c0_5, %c0_6] : memref<128x384xf32, #tpu.memory_space<vmem>>, vector<128x384xf32>
    %c0_7 = arith.constant 0 : index
    %c0_8 = arith.constant 0 : index
    %5 = vector.load %arg5[%c0_7, %c0_8] : memref<1x384xf32, #tpu.memory_space<vmem>>, vector<1x384xf32>
    %c0_9 = arith.constant 0 : index
    %c0_10 = arith.constant 0 : index
    %6 = vector.load %arg6[%c0_9, %c0_10] : memref<1x384xf32, #tpu.memory_space<vmem>>, vector<1x384xf32>
    %cst = arith.constant dense<0.000000e+00> : vector<16x128xf32>
    %7 = tpu.matmul %1, %2, %cst {dimension_numbers = #tpu.dot_dimension_numbers<[1], [0], [0], [1], [0, 0, 1, 1], [], []>} : vector<16x16xf32>, vector<16x128xf32>, vector<16x128xf32> -> vector<16x128xf32>
    %cst_11 = arith.constant dense<0.000000e+00> : vector<16x384xf32>
    %8 = tpu.matmul %7, %3, %cst_11 {dimension_numbers = #tpu.dot_dimension_numbers<[1], [0], [0], [1], [0, 0, 1, 1], [], []>} : vector<16x128xf32>, vector<128x384xf32>, vector<16x384xf32> -> vector<16x384xf32>
    %9 = vector.broadcast %5 : vector<1x384xf32> to vector<16x384xf32>
    %10 = arith.addf %8, %9 : vector<16x384xf32>
    %cst_12 = arith.constant dense<0.000000e+00> : vector<16x384xf32>
    %11 = tpu.matmul %2, %4, %cst_12 {dimension_numbers = #tpu.dot_dimension_numbers<[1], [0], [0], [1], [0, 0, 1, 1], [], []>} : vector<16x128xf32>, vector<128x384xf32>, vector<16x384xf32> -> vector<16x384xf32>
    %12 = vector.broadcast %6 : vector<1x384xf32> to vector<16x384xf32>
    %13 = arith.addf %11, %12 : vector<16x384xf32>
    %14 = vector.extract_strided_slice %10 {offsets = [0, 0], sizes = [16, 128], strides = [1, 1]} : vector<16x384xf32> to vector<16x128xf32>
    %15 = vector.extract_strided_slice %13 {offsets = [0, 0], sizes = [16, 128], strides = [1, 1]} : vector<16x384xf32> to vector<16x128xf32>
    %16 = arith.addf %14, %15 : vector<16x128xf32>
    %cst_13 = arith.constant 5.000000e-01 : f32
    %17 = vector.broadcast %cst_13 : f32 to vector<16x128xf32>
    %18 = arith.mulf %17, %16 : vector<16x128xf32>
    %19 = math.tanh %18 : vector<16x128xf32>
    %cst_14 = arith.constant 1.000000e+00 : f32
    %20 = vector.broadcast %cst_14 : f32 to vector<16x128xf32>
    %21 = arith.addf %20, %19 : vector<16x128xf32>
    %cst_15 = arith.constant 5.000000e-01 : f32
    %22 = vector.broadcast %cst_15 : f32 to vector<16x128xf32>
    %23 = arith.mulf %22, %21 : vector<16x128xf32>
    %24 = vector.extract_strided_slice %10 {offsets = [0, 128], sizes = [16, 128], strides = [1, 1]} : vector<16x384xf32> to vector<16x128xf32>
    %25 = vector.extract_strided_slice %13 {offsets = [0, 128], sizes = [16, 128], strides = [1, 1]} : vector<16x384xf32> to vector<16x128xf32>
    %26 = arith.addf %24, %25 : vector<16x128xf32>
    %cst_16 = arith.constant 5.000000e-01 : f32
    %27 = vector.broadcast %cst_16 : f32 to vector<16x128xf32>
    %28 = arith.mulf %27, %26 : vector<16x128xf32>
    %29 = math.tanh %28 : vector<16x128xf32>
    %cst_17 = arith.constant 1.000000e+00 : f32
    %30 = vector.broadcast %cst_17 : f32 to vector<16x128xf32>
    %31 = arith.addf %30, %29 : vector<16x128xf32>
    %cst_18 = arith.constant 5.000000e-01 : f32
    %32 = vector.broadcast %cst_18 : f32 to vector<16x128xf32>
    %33 = arith.mulf %32, %31 : vector<16x128xf32>
    %34 = vector.extract_strided_slice %10 {offsets = [0, 256], sizes = [16, 128], strides = [1, 1]} : vector<16x384xf32> to vector<16x128xf32>
    %35 = vector.extract_strided_slice %13 {offsets = [0, 256], sizes = [16, 128], strides = [1, 1]} : vector<16x384xf32> to vector<16x128xf32>
    %36 = arith.mulf %23, %35 : vector<16x128xf32>
    %37 = arith.addf %34, %36 : vector<16x128xf32>
    %38 = math.tanh %37 : vector<16x128xf32>
    %39 = arith.subf %2, %38 : vector<16x128xf32>
    %40 = arith.mulf %33, %39 : vector<16x128xf32>
    %41 = arith.addf %38, %40 : vector<16x128xf32>
    %cst_19 = arith.constant dense<0.000000e+00> : vector<16x128xf32>
    %42 = tpu.matmul %1, %41, %cst_19 {dimension_numbers = #tpu.dot_dimension_numbers<[1], [0], [0], [1], [0, 0, 1, 1], [], []>} : vector<16x16xf32>, vector<16x128xf32>, vector<16x128xf32> -> vector<16x128xf32>
    %cst_20 = arith.constant dense<0.000000e+00> : vector<16x384xf32>
    %43 = tpu.matmul %42, %3, %cst_20 {dimension_numbers = #tpu.dot_dimension_numbers<[1], [0], [0], [1], [0, 0, 1, 1], [], []>} : vector<16x128xf32>, vector<128x384xf32>, vector<16x384xf32> -> vector<16x384xf32>
    %44 = vector.broadcast %5 : vector<1x384xf32> to vector<16x384xf32>
    %45 = arith.addf %43, %44 : vector<16x384xf32>
    %cst_21 = arith.constant dense<0.000000e+00> : vector<16x384xf32>
    %46 = tpu.matmul %41, %4, %cst_21 {dimension_numbers = #tpu.dot_dimension_numbers<[1], [0], [0], [1], [0, 0, 1, 1], [], []>} : vector<16x128xf32>, vector<128x384xf32>, vector<16x384xf32> -> vector<16x384xf32>
    %47 = vector.broadcast %6 : vector<1x384xf32> to vector<16x384xf32>
    %48 = arith.addf %46, %47 : vector<16x384xf32>
    %49 = vector.extract_strided_slice %45 {offsets = [0, 0], sizes = [16, 128], strides = [1, 1]} : vector<16x384xf32> to vector<16x128xf32>
    %50 = vector.extract_strided_slice %48 {offsets = [0, 0], sizes = [16, 128], strides = [1, 1]} : vector<16x384xf32> to vector<16x128xf32>
    %51 = arith.addf %49, %50 : vector<16x128xf32>
    %cst_22 = arith.constant 5.000000e-01 : f32
    %52 = vector.broadcast %cst_22 : f32 to vector<16x128xf32>
    %53 = arith.mulf %52, %51 : vector<16x128xf32>
    %54 = math.tanh %53 : vector<16x128xf32>
    %cst_23 = arith.constant 1.000000e+00 : f32
    %55 = vector.broadcast %cst_23 : f32 to vector<16x128xf32>
    %56 = arith.addf %55, %54 : vector<16x128xf32>
    %cst_24 = arith.constant 5.000000e-01 : f32
    %57 = vector.broadcast %cst_24 : f32 to vector<16x128xf32>
    %58 = arith.mulf %57, %56 : vector<16x128xf32>
    %59 = vector.extract_strided_slice %45 {offsets = [0, 128], sizes = [16, 128], strides = [1, 1]} : vector<16x384xf32> to vector<16x128xf32>
    %60 = vector.extract_strided_slice %48 {offsets = [0, 128], sizes = [16, 128], strides = [1, 1]} : vector<16x384xf32> to vector<16x128xf32>
    %61 = arith.addf %59, %60 : vector<16x128xf32>
    %cst_25 = arith.constant 5.000000e-01 : f32
    %62 = vector.broadcast %cst_25 : f32 to vector<16x128xf32>
    %63 = arith.mulf %62, %61 : vector<16x128xf32>
    %64 = math.tanh %63 : vector<16x128xf32>
    %cst_26 = arith.constant 1.000000e+00 : f32
    %65 = vector.broadcast %cst_26 : f32 to vector<16x128xf32>
    %66 = arith.addf %65, %64 : vector<16x128xf32>
    %cst_27 = arith.constant 5.000000e-01 : f32
    %67 = vector.broadcast %cst_27 : f32 to vector<16x128xf32>
    %68 = arith.mulf %67, %66 : vector<16x128xf32>
    %69 = vector.extract_strided_slice %45 {offsets = [0, 256], sizes = [16, 128], strides = [1, 1]} : vector<16x384xf32> to vector<16x128xf32>
    %70 = vector.extract_strided_slice %48 {offsets = [0, 256], sizes = [16, 128], strides = [1, 1]} : vector<16x384xf32> to vector<16x128xf32>
    %71 = arith.mulf %58, %70 : vector<16x128xf32>
    %72 = arith.addf %69, %71 : vector<16x128xf32>
    %73 = math.tanh %72 : vector<16x128xf32>
    %74 = arith.subf %41, %73 : vector<16x128xf32>
    %75 = arith.mulf %68, %74 : vector<16x128xf32>
    %76 = arith.addf %73, %75 : vector<16x128xf32>
    %c0_28 = arith.constant 0 : index
    %c0_29 = arith.constant 0 : index
    %77 = vector.load %arg7[%c0_28, %c0_29] : memref<128x128xf32, #tpu.memory_space<vmem>>, vector<128x128xf32>
    %cst_30 = arith.constant dense<0.000000e+00> : vector<16x128xf32>
    %78 = tpu.matmul %76, %77, %cst_30 {dimension_numbers = #tpu.dot_dimension_numbers<[1], [0], [0], [1], [0, 0, 1, 1], [], []>} : vector<16x128xf32>, vector<128x128xf32>, vector<16x128xf32> -> vector<16x128xf32>
    %c0_31 = arith.constant 0 : index
    %c0_32 = arith.constant 0 : index
    %79 = vector.load %arg8[%c0_31, %c0_32] : memref<128x128xf32, #tpu.memory_space<vmem>>, vector<128x128xf32>
    %cst_33 = arith.constant dense<0.000000e+00> : vector<16x128xf32>
    %80 = tpu.matmul %2, %79, %cst_33 {dimension_numbers = #tpu.dot_dimension_numbers<[1], [0], [0], [1], [0, 0, 1, 1], [], []>} : vector<16x128xf32>, vector<128x128xf32>, vector<16x128xf32> -> vector<16x128xf32>
    %81 = arith.addf %78, %80 : vector<16x128xf32>
    %c0_34 = arith.constant 0 : index
    %c0_35 = arith.constant 0 : index
    %82 = vector.load %arg9[%c0_34, %c0_35] : memref<1x128xf32, #tpu.memory_space<vmem>>, vector<1x128xf32>
    %83 = vector.broadcast %82 : vector<1x128xf32> to vector<16x128xf32>
    %84 = arith.addf %81, %83 : vector<16x128xf32>
    %85 = math.absf %84 : vector<16x128xf32>
    %cst_36 = arith.constant 1.000000e+00 : f32
    %86 = vector.broadcast %cst_36 : f32 to vector<16x128xf32>
    %87 = arith.addf %86, %85 : vector<16x128xf32>
    %88 = tpu.reciprocal %87 {approx = true} : vector<16x128xf32> -> vector<16x128xf32>
    %89 = arith.mulf %84, %88 : vector<16x128xf32>
    %c0_37 = arith.constant 0 : index
    %c0_38 = arith.constant 0 : index
    %90 = vector.load %arg10[%c0_37, %c0_38] : memref<128x128xf32, #tpu.memory_space<vmem>>, vector<128x128xf32>
    %cst_39 = arith.constant dense<0.000000e+00> : vector<16x128xf32>
    %91 = tpu.matmul %89, %90, %cst_39 {dimension_numbers = #tpu.dot_dimension_numbers<[1], [0], [0], [1], [0, 0, 1, 1], [], []>} : vector<16x128xf32>, vector<128x128xf32>, vector<16x128xf32> -> vector<16x128xf32>
    %c0_40 = arith.constant 0 : index
    %c0_41 = arith.constant 0 : index
    %92 = vector.load %arg11[%c0_40, %c0_41] : memref<1x128xf32, #tpu.memory_space<vmem>>, vector<1x128xf32>
    %93 = vector.broadcast %92 : vector<1x128xf32> to vector<16x128xf32>
    %94 = arith.addf %91, %93 : vector<16x128xf32>
    %95 = math.absf %94 : vector<16x128xf32>
    %cst_42 = arith.constant 1.000000e+00 : f32
    %96 = vector.broadcast %cst_42 : f32 to vector<16x128xf32>
    %97 = arith.addf %96, %95 : vector<16x128xf32>
    %98 = tpu.reciprocal %97 {approx = true} : vector<16x128xf32> -> vector<16x128xf32>
    %99 = arith.mulf %94, %98 : vector<16x128xf32>
    %100 = math.exp %99 : vector<16x128xf32>
    %c0_43 = arith.constant 0 : index
    %c0_44 = arith.constant 0 : index
    %101 = vector.load %arg14[%c0_43, %c0_44] : memref<1x128xf32, #tpu.memory_space<vmem>>, vector<1x128xf32>
    %102 = vector.broadcast %101 : vector<1x128xf32> to vector<16x128xf32>
    %103 = arith.mulf %100, %102 : vector<16x128xf32>
    %cst_45 = arith.constant dense<0.000000e+00> : vector<16xf32>
    %104 = vector.multi_reduction <add>, %103, %cst_45 [1] : vector<16x128xf32> to vector<16xf32>
    %105 = vector.shape_cast %104 : vector<16xf32> to vector<16x1xf32>
    %106 = tpu.reciprocal %105 {approx = true} : vector<16x1xf32> -> vector<16x1xf32>
    %107 = vector.broadcast %106 : vector<16x1xf32> to vector<16x128xf32>
    %108 = arith.mulf %103, %107 : vector<16x128xf32>
    %c0_46 = arith.constant 0 : index
    %c0_47 = arith.constant 0 : index
    %109 = vector.load %arg12[%c0_46, %c0_47] : memref<128x128xf32, #tpu.memory_space<vmem>>, vector<128x128xf32>
    %cst_48 = arith.constant dense<0.000000e+00> : vector<16x128xf32>
    %110 = tpu.matmul %2, %109, %cst_48 {dimension_numbers = #tpu.dot_dimension_numbers<[1], [0], [0], [1], [0, 0, 1, 1], [], []>} : vector<16x128xf32>, vector<128x128xf32>, vector<16x128xf32> -> vector<16x128xf32>
    %c0_49 = arith.constant 0 : index
    %c0_50 = arith.constant 0 : index
    %111 = vector.load %arg13[%c0_49, %c0_50] : memref<1x128xf32, #tpu.memory_space<vmem>>, vector<1x128xf32>
    %112 = vector.broadcast %111 : vector<1x128xf32> to vector<16x128xf32>
    %113 = arith.addf %110, %112 : vector<16x128xf32>
    %114 = math.absf %113 : vector<16x128xf32>
    %cst_51 = arith.constant 1.000000e+00 : f32
    %115 = vector.broadcast %cst_51 : f32 to vector<16x128xf32>
    %116 = arith.addf %115, %114 : vector<16x128xf32>
    %117 = tpu.reciprocal %116 {approx = true} : vector<16x128xf32> -> vector<16x128xf32>
    %118 = arith.mulf %113, %117 : vector<16x128xf32>
    %119 = arith.mulf %108, %118 : vector<16x128xf32>
    %c0_52 = arith.constant 0 : index
    %c0_53 = arith.constant 0 : index
    %120 = vector.load %arg15[%c0_52, %c0_53] : memref<16x128xf32, #tpu.memory_space<vmem>>, vector<16x128xf32>
    tpu.vector_store %arg15[%c0_52, %c0_53], %119 {strides = array<i32>} : memref<16x128xf32, #tpu.memory_space<vmem>>, vector<16x128xf32>,
    return
  }
  func.func @transform_0(%arg0: i32) -> (i32, i32) {
    %c0_i32 = arith.constant 0 : i32
    %c0_i32_0 = arith.constant 0 : i32
    %c0_i32_1 = arith.constant 0 : i32
    return %c0_i32, %c0_i32_0 : i32, i32
  }
  func.func @transform_1(%arg0: i32) -> (i32, i32) {
    %c0_i32 = arith.constant 0 : i32
    %c0_i32_0 = arith.constant 0 : i32
    %c0_i32_1 = arith.constant 0 : i32
    return %c0_i32, %c0_i32_0 : i32, i32
  }
  func.func @transform_2(%arg0: i32) -> (i32, i32) {
    %c0_i32 = arith.constant 0 : i32
    %c0_i32_0 = arith.constant 0 : i32
    %c0_i32_1 = arith.constant 0 : i32
    return %c0_i32, %c0_i32_0 : i32, i32
  }
  func.func @transform_3(%arg0: i32) -> (i32, i32) {
    %c0_i32 = arith.constant 0 : i32
    %c0_i32_0 = arith.constant 0 : i32
    %c0_i32_1 = arith.constant 0 : i32
    return %c0_i32, %c0_i32_0 : i32, i32
  }
  func.func @transform_4(%arg0: i32) -> (i32, i32) {
    %c0_i32 = arith.constant 0 : i32
    %c0_i32_0 = arith.constant 0 : i32
    %c0_i32_1 = arith.constant 0 : i32
    return %c0_i32, %c0_i32_0 : i32, i32
  }
  func.func @transform_5(%arg0: i32) -> (i32, i32) {
    %c0_i32 = arith.constant 0 : i32
    %c0_i32_0 = arith.constant 0 : i32
    %c0_i32_1 = arith.constant 0 : i32
    return %c0_i32, %c0_i32_0 : i32, i32
  }
  func.func @transform_6(%arg0: i32) -> (i32, i32) {
    %c0_i32 = arith.constant 0 : i32
    %c0_i32_0 = arith.constant 0 : i32
    %c0_i32_1 = arith.constant 0 : i32
    return %c0_i32, %c0_i32_0 : i32, i32
  }
  func.func @transform_7(%arg0: i32) -> (i32, i32) {
    %c0_i32 = arith.constant 0 : i32
    %c0_i32_0 = arith.constant 0 : i32
    %c0_i32_1 = arith.constant 0 : i32
    return %c0_i32, %c0_i32_0 : i32, i32
  }
  func.func @transform_8(%arg0: i32) -> (i32, i32) {
    %c0_i32 = arith.constant 0 : i32
    %c0_i32_0 = arith.constant 0 : i32
    %c0_i32_1 = arith.constant 0 : i32
    return %c0_i32, %c0_i32_0 : i32, i32
  }
  func.func @transform_9(%arg0: i32) -> (i32, i32) {
    %c0_i32 = arith.constant 0 : i32
    %c0_i32_0 = arith.constant 0 : i32
    %c0_i32_1 = arith.constant 0 : i32
    return %c0_i32, %c0_i32_0 : i32, i32
  }
  func.func @transform_10(%arg0: i32) -> (i32, i32) {
    %c0_i32 = arith.constant 0 : i32
    %c0_i32_0 = arith.constant 0 : i32
    %c0_i32_1 = arith.constant 0 : i32
    return %c0_i32, %c0_i32_0 : i32, i32
  }
  func.func @transform_11(%arg0: i32) -> (i32, i32) {
    %c0_i32 = arith.constant 0 : i32
    %c0_i32_0 = arith.constant 0 : i32
    %c0_i32_1 = arith.constant 0 : i32
    return %c0_i32, %c0_i32_0 : i32, i32
  }
  func.func @transform_12(%arg0: i32) -> (i32, i32) {
    %c0_i32 = arith.constant 0 : i32
    %c0_i32_0 = arith.constant 0 : i32
    %c0_i32_1 = arith.constant 0 : i32
    return %c0_i32, %c0_i32_0 : i32, i32
  }
  func.func @transform_13(%arg0: i32) -> (i32, i32) {
    %c0_i32 = arith.constant 0 : i32
    %c0_i32_0 = arith.constant 0 : i32
    %c0_i32_1 = arith.constant 0 : i32
    return %c0_i32, %c0_i32_0 : i32, i32
  }
  func.func @transform_14(%arg0: i32) -> (i32, i32) {
    %c0_i32 = arith.constant 0 : i32
    %c0_i32_0 = arith.constant 0 : i32
    %c0_i32_1 = arith.constant 0 : i32
    return %c0_i32, %c0_i32_0 : i32, i32
  }
}

</mosaic_0001>

<bundles_post_ra>
// kernel: tpu_custom_call.1
= control target key start
LH: loop header
LB: loop body
LE: loop exit
PB: predicated region body
PF: predicated region fallthrough
CT: control target
= control target key end

     0   :  { %19 = vsyncpa [#allocation3], 0  ;;  %s3280_s0 = inlined_call_operand.hbm [shape: bf16[16,16], index: 0, kind: input, shape index: {}]   ;;  %s3281_s1 = inlined_call_operand.hbm [shape: f32[16,128], index: 1, kind: input, shape index: {}]   ;;  %s3282_s2 = inlined_call_operand.hbm [shape: f32[128,384], index: 2, kind: input, shape index: {}]   ;;  %s3283_s3 = inlined_call_operand.hbm [shape: f32[128,384], index: 3, kind: input, shape index: {}]   ;;  %s3284_s4 = inlined_call_operand.vmem [shape: f32[1,384], index: 4, kind: input, shape index: {}]   ;;  %s3285_s5 = inlined_call_operand.vmem [shape: f32[1,384], index: 5, kind: input, shape index: {}]   ;;  %s3286_s6 = inlined_call_operand.hbm [shape: f32[128,128], index: 6, kind: input, shape index: {}]   ;;  %s3287_s7 = inlined_call_operand.hbm [shape: f32[128,128], index: 7, kind: input, shape index: {}]   ;;  %s3288_s8 = inlined_call_operand.vmem [shape: f32[1,128], index: 8, kind: input, shape index: {}]   ;;  %s3289_s9 = inlined_call_operand.hbm [shape: f32[128,128], index: 9, kind: input, shape index: {}]   ;;  %s3290_s10 = inlined_call_operand.vmem [shape: f32[1,128], index: 10, kind: input, shape index: {}]   ;;  %s3291_s11 = inlined_call_operand.hbm [shape: f32[128,128], index: 11, kind: input, shape index: {}]   ;;  %s3292_s12 = inlined_call_operand.vmem [shape: f32[1,128], index: 12, kind: input, shape index: {}]   ;;  %s3293_s13 = inlined_call_operand.vmem [shape: f32[1,128], index: 13, kind: input, shape index: {}]   ;;  %s3294_s14 = inlined_call_operand.hbm [shape: f32[16,128], index: 14, kind: output, shape index: {}]  }
   0x1   :  { %20 = vsyncpa [#allocation6], 0 }
   0x2   :  { %21 = vsyncpa [#allocation9], 0 }
   0x3   :  { %22 = vsyncpa [#allocation12], 0 }
   0x4   :  { %23 = vsyncpa [#allocation15], 0 }
   0x5   :  { %24 = vsyncpa [#allocation4], 0  ;;  %s2727_s29 = smov [#allocation5]   ;;  %s2517_s17 = scalar_lea.hbm %s3281_s1, 256 }
   0x6   :  { %s42_s30 = sshll.u32 %s2727_s29, 4  ;;  %p2518_p0 = scmp.ne.s32.totalorder %s3281_s1, %s2517_s17  ;;  %s43_s30 = int_to_ptr.vmem [resolvable:$true] %s42_s30 }
   0x7   :  { %p2521_p1 = scmp.lt.u32.totalorder %s2517_s17, %s3281_s1 }
   0x9   :  { %p2523_p2 = pnand %p2521_p1, %p2518_p0 }
   0xb   :  { %2526 = shalt.err (!%p2523_p2)
}
   0xc   :  { %s2527_s22 = scalar_lea.vmem %s43_s30, 256  ;;  %p2532_p4 = scmp.lt.s32.totalorder %s43_s30, %s43_s30 }
   0xd   :  { %p2528_p3 = scmp.ne.s32.totalorder %s43_s30, %s2527_s22  ;;  %p2533_p5 = scmp.lt.s32.totalorder %s2527_s22, %s2527_s22 }
   0xf   :  { %p2534_p6 = por %p2533_p5, %p2532_p4 }
  0x11   :  { %p2535_p7 = pnand %p2534_p6, %p2528_p3 }
  0x13   :  { %2538 = shalt.err (!%p2535_p7)
}
  0x14   :  { %s3295_s23 = smov 128   ;;  %s2729_s24 = smov 8  }
  0x15   :  { %48 = dma.hbm_to_vmem [thread:$0]  %s3281_s1, 256, %s43_s30, [#allocation6], %s3295_s23, %s3295_s23, %s2729_s24  }
  0x16   :  { %s2730_s27 = smov [#allocation8]   ;;  %s2731_s29 = smov [#allocation11]  }
  0x17   :  { %s66_s28 = sshll.u32 %s2730_s27, 4  ;;  %s94_s15 = sshll.u32 %s2731_s29, 4  ;;  %s67_s28 = int_to_ptr.vmem [resolvable:$true] %s66_s28  ;;  %s95_s15 = int_to_ptr.vmem [resolvable:$true] %s94_s15 }
  0x18   :  { %s2539_s18 = scalar_lea.hbm %s3283_s3, 6144 }
  0x19   :  { %p2540_p8 = scmp.ne.s32.totalorder %s3283_s3, %s2539_s18  ;;  %p2543_p9 = scmp.lt.u32.totalorder %s2539_s18, %s3283_s3 }
  0x1b   :  { %p2545_p10 = pnand %p2543_p9, %p2540_p8 }
  0x1d   :  { %2548 = shalt.err (!%p2545_p10)
}
  0x1e   :  { %s2549_s1 = scalar_lea.vmem %s67_s28, 6144  ;;  %p2554_p12 = scmp.lt.s32.totalorder %s67_s28, %s67_s28 }
  0x1f   :  { %p2550_p11 = scmp.ne.s32.totalorder %s67_s28, %s2549_s1  ;;  %p2555_p13 = scmp.lt.s32.totalorder %s2549_s1, %s2549_s1 }
  0x21   :  { %p2556_p0 = por %p2555_p13, %p2554_p12 }
  0x23   :  { %p2557_p1 = pnand %p2556_p0, %p2550_p11 }
  0x25   :  { %2560 = shalt.err (!%p2557_p1)
}
  0x26   :  { %s2732_s30 = smov 384   ;;  %s2733_s25 = smov 24  }
  0x27   :  { %72 = dma.hbm_to_vmem [thread:$0]  %s3283_s3, 6144, %s67_s28, [#allocation9], %s2732_s30, %s2732_s30, %s2733_s25  }
  0x28   :  { %s2561_s17 = scalar_lea.hbm %s3287_s7, 2048 }
  0x29   :  { %p2562_p2 = scmp.ne.s32.totalorder %s3287_s7, %s2561_s17  ;;  %p2565_p3 = scmp.lt.u32.totalorder %s2561_s17, %s3287_s7 }
  0x2b   :  { %p2567_p4 = pnand %p2565_p3, %p2562_p2 }
  0x2d   :  { %2570 = shalt.err (!%p2567_p4)
}
  0x2e   :  { %s2571_s22 = scalar_lea.vmem %s95_s15, 2048  ;;  %p2576_p6 = scmp.lt.s32.totalorder %s95_s15, %s95_s15 }
  0x2f   :  { %p2572_p5 = scmp.ne.s32.totalorder %s95_s15, %s2571_s22  ;;  %p2577_p7 = scmp.lt.s32.totalorder %s2571_s22, %s2571_s22 }
  0x31   :  { %p2578_p8 = por %p2577_p7, %p2576_p6 }
  0x33   :  { %p2579_p9 = pnand %p2578_p8, %p2572_p5 }
  0x35   :  { %2582 = shalt.err (!%p2579_p9)
}
  0x36   :  { %100 = dma.hbm_to_vmem [thread:$0]  %s3287_s7, 2048, %s95_s15, [#allocation12], %s3295_s23, %s3295_s23, %s2729_s24  }
  0x37   :  { %s2734_s1 = smov [#allocation2]   ;;  %s2583_s16 = scalar_lea.hbm %s3280_s0, 128 }
  0x38   :  { %s30_s26 = sshll.u32 %s2734_s1, 4  ;;  %p2584_p10 = scmp.ne.s32.totalorder %s3280_s0, %s2583_s16  ;;  %s31_s26 = int_to_ptr.vmem [resolvable:$true] %s30_s26 }
  0x39   :  { %p2587_p11 = scmp.lt.u32.totalorder %s2583_s16, %s3280_s0 }
  0x3b   :  { %p2589_p12 = pnand %p2587_p11, %p2584_p10 }
  0x3d   :  { %2592 = shalt.err (!%p2589_p12)
}
  0x3e   :  { %s2593_s21 = scalar_lea.vmem %s31_s26, 128  ;;  %p2598_p0 = scmp.lt.s32.totalorder %s31_s26, %s31_s26 }
  0x3f   :  { %p2594_p13 = scmp.ne.s32.totalorder %s31_s26, %s2593_s21  ;;  %p2599_p1 = scmp.lt.s32.totalorder %s2593_s21, %s2593_s21 }
  0x41   :  { %p2600_p2 = por %p2599_p1, %p2598_p0 }
  0x43   :  { %p2601_p3 = pnand %p2600_p2, %p2594_p13 }
  0x45   :  { %2604 = shalt.err (!%p2601_p3)
}
  0x46   :  { %s2735_s7 = smov 64   ;;  %s2736_s15 = smov 4  }
  0x47   :  { %36 = dma.hbm_to_vmem [thread:$0]  %s3280_s0, 128, %s31_s26, [#allocation3], %s2735_s7, %s2735_s7, %s2736_s15  }
  0x48   :  { %s2737_s28 = smov [#allocation7]   ;;  %s2738_s27 = smov [#allocation10]  }
  0x49   :  { %s54_s1 = sshll.u32 %s2737_s28, 4  ;;  %s82_s29 = sshll.u32 %s2738_s27, 4  ;;  %s55_s1 = int_to_ptr.vmem [resolvable:$true] %s54_s1  ;;  %s2875_s29 = int_to_ptr.vmem [resolvable:$true] %s82_s29 }
  0x4a   :  { %s2605_s18 = scalar_lea.hbm %s3282_s2, 6144 }
  0x4b   :  { %p2606_p4 = scmp.ne.s32.totalorder %s3282_s2, %s2605_s18  ;;  %p2609_p5 = scmp.lt.u32.totalorder %s2605_s18, %s3282_s2 }
  0x4d   :  { %p2611_p6 = pnand %p2609_p5, %p2606_p4 }
  0x4f   :  { %2614 = shalt.err (!%p2611_p6)
}
  0x50   :  { %s2615_s0 = scalar_lea.vmem %s55_s1, 6144  ;;  %p2620_p8 = scmp.lt.s32.totalorder %s55_s1, %s55_s1 }
  0x51   :  { %p2616_p7 = scmp.ne.s32.totalorder %s55_s1, %s2615_s0  ;;  %p2621_p9 = scmp.lt.s32.totalorder %s2615_s0, %s2615_s0 }
  0x53   :  { %p2622_p10 = por %p2621_p9, %p2620_p8 }
  0x55   :  { %p2623_p11 = pnand %p2622_p10, %p2616_p7 }
  0x57   :  { %2626 = shalt.err (!%p2623_p11)
}
  0x58   :  { %60 = dma.hbm_to_vmem [thread:$0]  %s3282_s2, 6144, %s55_s1, [#allocation6], %s2732_s30, %s2732_s30, %s2733_s25  }
  0x59   :  { %s2627_s23 = scalar_lea.hbm %s3286_s6, 2048 }
  0x5a   :  { %p2628_p12 = scmp.ne.s32.totalorder %s3286_s6, %s2627_s23  ;;  %p2631_p13 = scmp.lt.u32.totalorder %s2627_s23, %s3286_s6 }
  0x5c   :  { %p2633_p0 = pnand %p2631_p13, %p2628_p12 }
  0x5e   :  { %2636 = shalt.err (!%p2633_p0)
}
  0x5f   :  { %s2637_s17 = scalar_lea.vmem %s2875_s29, 2048  ;;  %p2642_p2 = scmp.lt.s32.totalorder %s2875_s29, %s2875_s29 }
  0x60   :  { %p2638_p1 = scmp.ne.s32.totalorder %s2875_s29, %s2637_s17  ;;  %p2643_p3 = scmp.lt.s32.totalorder %s2637_s17, %s2637_s17 }
  0x62   :  { %p2644_p4 = por %p2643_p3, %p2642_p2 }
  0x64   :  { %p2645_p5 = pnand %p2644_p4, %p2638_p1 }
  0x66   :  { %2648 = shalt.err (!%p2645_p5)
}
  0x67   :  { %s3297_s2 = smov 128   ;;  %s2739_s1 = smov [#allocation13]  }
  0x68   :  { %88 = dma.hbm_to_vmem [thread:$0]  %s3286_s6, 2048, %s2875_s29, [#allocation9], %s3297_s2, %s3297_s2, %s2729_s24  }
  0x69   :  { %s108_s18 = sshll.u32 %s2739_s1, 4  ;;  %s2740_s19 = smov [#allocation14]   ;;  %s109_s18 = int_to_ptr.vmem [resolvable:$true] %s108_s18 }
  0x6a   :  { %s122_s20 = sshll.u32 %s2740_s19, 4  ;;  %s2649_s26 = scalar_lea.hbm %s3289_s9, 2048  ;;  %s2912_s20 = int_to_ptr.vmem [resolvable:$true] %s122_s20 }
  0x6b   :  { %p2650_p6 = scmp.ne.s32.totalorder %s3289_s9, %s2649_s26  ;;  %p2653_p7 = scmp.lt.u32.totalorder %s2649_s26, %s3289_s9 }
  0x6d   :  { %p2655_p8 = pnand %p2653_p7, %p2650_p6 }
  0x6f   :  { %2658 = shalt.err (!%p2655_p8)
}
  0x70   :  { %s2659_s6 = scalar_lea.vmem %s109_s18, 2048  ;;  %p2664_p10 = scmp.lt.s32.totalorder %s109_s18, %s109_s18 }
  0x71   :  { %p2660_p9 = scmp.ne.s32.totalorder %s109_s18, %s2659_s6  ;;  %p2665_p11 = scmp.lt.s32.totalorder %s2659_s6, %s2659_s6 }
  0x73   :  { %p2666_p12 = por %p2665_p11, %p2664_p10 }
  0x75   :  { %p2667_p13 = pnand %p2666_p12, %p2660_p9 }
  0x77   :  { %2670 = shalt.err (!%p2667_p13)
}
  0x78   :  { %114 = dma.hbm_to_vmem [thread:$0]  %s3289_s9, 2048, %s109_s18, [#allocation12], %s3297_s2, %s3297_s2, %s2729_s24  }
  0x79   :  { %s2671_s16 = scalar_lea.hbm %s3291_s11, 2048 }
  0x7a   :  { %p2672_p0 = scmp.ne.s32.totalorder %s3291_s11, %s2671_s16  ;;  %p2675_p1 = scmp.lt.u32.totalorder %s2671_s16, %s3291_s11 }
  0x7c   :  { %p2677_p2 = pnand %p2675_p1, %p2672_p0 }
  0x7e   :  { %2680 = shalt.err (!%p2677_p2)
}
  0x7f   :  { %s2681_s19 = scalar_lea.vmem %s2912_s20, 2048  ;;  %p2686_p4 = scmp.lt.s32.totalorder %s2912_s20, %s2912_s20 }
  0x80   :  { %p2682_p3 = scmp.ne.s32.totalorder %s2912_s20, %s2681_s19  ;;  %p2687_p5 = scmp.lt.s32.totalorder %s2681_s19, %s2681_s19 }
  0x82   :  { %p2688_p6 = por %p2687_p5, %p2686_p4 }
  0x84   :  { %p2689_p7 = pnand %p2688_p6, %p2682_p3 }
  0x86   :  { %2692 = shalt.err (!%p2689_p7)
}
  0x87   :  { %128 = dma.hbm_to_vmem [thread:$0]  %s3291_s11, 2048, %s2912_s20, [#allocation15], %s3297_s2, %s3297_s2, %s2729_s24  }
  0x88   :  { %2715 = dma.done.wait [#allocation3], 128  }
  0x89   :  { %2716 = vsyncadd [#allocation3], 4294967168 }
  0x8a   :  { %2717 = dma.done.wait [#allocation6], 6400  }
  0x8b   :  { %2718 = vsyncadd [#allocation6], 4294960896 }
  0x8c   :  { %2719 = dma.done.wait [#allocation9], 8192  }
  0x8d   :  { %2720 = vsyncadd [#allocation9], 4294959104 }
  0x8e   :  { %2721 = dma.done.wait [#allocation12], 4096  }
  0x8f   :  { %2722 = vsyncadd [#allocation12], 4294963200 }
  0x90   :  { %2723 = dma.done.wait [#allocation15], 2048  }
  0x91   :  { %2724 = vsyncadd [#allocation15], 4294965248  ;;  %v2949_v0 = vld [vmem:[#allocation5] sm:$0xff]  ;;  %v2951_v1 = vld [vmem:[#allocation5 + $0x8] sm:$0xff]  ;;  %vm261_vm0 = vcmask 130048  }
  0x92   :  { %v2953_v2 = vld [vmem:[#allocation2] sm:$0xff]   ;;  %v2037_v3 = vpack.c.bf16 %v2951_v1, %v2949_v0  ;;  %v167_v6 = vld [vmem:[#allocation7 + $0x20] sm:$0xff]  ;;  %v166_v9 = vld [vmem:[#allocation7 + $0x18] sm:$0xff] }
  0x93   :  { %v1589_v4 = vunpack.c.l.bf16 %v2953_v2  ;;  %v164_v5 = vld [vmem:[#allocation7 + $0x8] sm:$0xff]  ;;  %v163_v7 = vld [vmem:[#allocation7] sm:$0xff]  ;;  %v165_v10 = vld [vmem:[#allocation7 + $0x10] sm:$0xff]  ;;  %v1590_v12 = vunpack.c.h.bf16 %v2953_v2 }
  0x94   :  { %v2958_v8 = vpack.c.bf16 %v167_v6, %v164_v5  ;;  %v168_v11 = vld [vmem:[#allocation7 + $0x28] sm:$0xff]  ;;  %2038 = vmatprep.subr.bf16.mxu1 %v2037_v3  ;;  %v170_v14 = vld [vmem:[#allocation7 + $0x38] sm:$0xff]  ;;  %v173_v15 = vld [vmem:[#allocation7 + $0x50] sm:$0xff]  ;;  %v2966_v16 = vpack.c.bf16 %v166_v9, %v163_v7 }
  0x95   :  { %1747 = vmatprep.mubr.msk.f32.mxu1 %vm261_vm0, %v1589_v4  ;;  %v2964_v13 = vpack.c.bf16 %v168_v11, %v165_v10  ;;  %2040 = vmatpush3.bf16.msra.mxu1 %v2037_v3  ;;  %v171_v17 = vld [vmem:[#allocation7 + $0x40] sm:$0xff]  ;;  %v174_v18 = vld [vmem:[#allocation7 + $0x58] sm:$0xff]  ;;  %v2970_v19 = vpack.c.bf16 %v173_v15, %v170_v14  ;;  %v169_v20 = vld [vmem:[#allocation7 + $0x30] sm:$0xff] }
  0x96   :  { %2042 = vmatprep.subr.bf16.mxu1 %v2958_v8  ;;  %v172_v21 = vld [vmem:[#allocation7 + $0x48] sm:$0xff]  ;;  %v2972_v22 = vpack.c.bf16 %v174_v18, %v171_v17  ;;  %v179_v24 = vld [vmem:[#allocation7 + $0x80] sm:$0xff]  ;;  %v177_v25 = vld [vmem:[#allocation7 + $0x70] sm:$0xff] }
  0x97   :  { %2074 = vmatprep.subr.bf16.mxu0 %v2964_v13  ;;  %v176_v23 = vld [vmem:[#allocation7 + $0x68] sm:$0xff]  ;;  %v2982_v28 = vpack.c.bf16 %v172_v21, %v169_v20  ;;  %v183_v29 = vld [vmem:[#allocation7 + $0xa0] sm:$0xff]  ;;  %v186_v30 = vld [vmem:[#allocation7 + $0xb8] sm:$0xff] }
  0x98   :  { %2076 = vmatpush3.bf16.msra.mxu0 %v2964_v13  ;;  %v180_v26 = vld [vmem:[#allocation7 + $0x88] sm:$0xff]  ;;  %1748 = vmatmul.mubr.msk.f32.vlgmr.msra.gmra.mrb[0].mxu1 %vm261_vm0, %v1590_v12  ;;  %v2985_v31 = vpack.c.bf16 %v179_v24, %v176_v23  ;;  %v175_v32 = vld [vmem:[#allocation7 + $0x60] sm:$0xff]  ;;  %v178_v33 = vld [vmem:[#allocation7 + $0x78] sm:$0xff]  ;;  %v2989_v36 = vpack.c.bf16 %v186_v30, %v183_v29  ;;  %v2741_v29 = vmov 0.0  }
  0x99   :  { %2078 = vmatprep.subr.bf16.mxu0 %v2972_v22  ;;  %v2979_v27 = vpack.c.bf16 %v180_v26, %v177_v25  ;;  %2044 = vmatpush1.bf16.msra.mxu1 %v2966_v16  ;;  %v182_v34 = vld [vmem:[#allocation7 + $0x98] sm:$0xff]  ;;  %v185_v35 = vld [vmem:[#allocation7 + $0xb0] sm:$0xff]  ;;  %v2992_v37 = vpack.c.bf16 %v178_v33, %v175_v32  ;;  %v192_v39 = vld [vmem:[#allocation7 + $0xe8] sm:$0xff] }
  0x9a   :  { %2046 = vmatprep.subr.bf16.mxu1 %v2970_v19  ;;  %v189_v38 = vld [vmem:[#allocation7 + $0xd0] sm:$0xff]  ;;  %v2995_v40 = vpack.c.bf16 %v185_v35, %v182_v34  ;;  %v184_v42 = vld [vmem:[#allocation7 + $0xa8] sm:$0xff]  ;;  %v191_v44 = vld [vmem:[#allocation7 + $0xe0] sm:$0xff]  ;;  %423 = vmatprep.mubr.f32.mxu1 %v2741_v29 }
  0x9b   :  { %v181_v41 = vld [vmem:[#allocation7 + $0x90] sm:$0xff]  ;;  %v188_v43 = vld [vmem:[#allocation7 + $0xc8] sm:$0xff]  ;;  %v2999_v45 = vpack.c.bf16 %v192_v39, %v189_v38  ;;  %v195_v47 = vld [vmem:[#allocation7 + $0x100] sm:$0xff] }
  0x9c   :  { %2080 = vmatpush3.bf16.msra.mxu0 %v2972_v22  ;;  %v3002_v46 = vpack.c.bf16 %v184_v42, %v181_v41  ;;  %v198_v48 = vld [vmem:[#allocation7 + $0x118] sm:$0xff]  ;;  %v3005_v49 = vpack.c.bf16 %v191_v44, %v188_v43  ;;  %v187_v50 = vld [vmem:[#allocation7 + $0xc0] sm:$0xff]  ;;  %v197_v53 = vld [vmem:[#allocation7 + $0x110] sm:$0xff] }
  0x9d   :  { %2082 = vmatprep.subr.bf16.mxu0 %v2979_v27  ;;  %2048 = vmatpush1.bf16.msra.mxu1 %v2982_v28  ;;  %v190_v51 = vld [vmem:[#allocation7 + $0xd8] sm:$0xff]  ;;  %v3009_v54 = vpack.c.bf16 %v198_v48, %v195_v47  ;;  %v201_v56 = vld [vmem:[#allocation7 + $0x130] sm:$0xff]  ;;  %v204_v57 = vld [vmem:[#allocation7 + $0x148] sm:$0xff] }
  0x9e   :  { %2050 = vmatprep.subr.bf16.mxu1 %v2985_v31  ;;  %v194_v52 = vld [vmem:[#allocation7 + $0xf8] sm:$0xff]  ;;  %v3012_v55 = vpack.c.bf16 %v190_v51, %v187_v50  ;;  %v193_v59 = vld [vmem:[#allocation7 + $0xf0] sm:$0xff]  ;;  %v196_v60 = vld [vmem:[#allocation7 + $0x108] sm:$0xff]  ;;  %v3019_v63 = vpack.c.bf16 %v204_v57, %v201_v56 }
  0x9f   :  { %v3015_v58 = vpack.c.bf16 %v197_v53, %v194_v52  ;;  %v200_v61 = vld [vmem:[#allocation7 + $0x128] sm:$0xff]  ;;  %v203_v62 = vld [vmem:[#allocation7 + $0x140] sm:$0xff]  ;;  %v3022_v3 = vpack.c.bf16 %v196_v60, %v193_v59  ;;  %v210_v6 = vld [vmem:[#allocation7 + $0x178] sm:$0xff] }
  0xa0   :  { %2084 = vmatpush3.bf16.msra.mxu0 %v2979_v27  ;;  %v207_v5 = vld [vmem:[#allocation7 + $0x160] sm:$0xff]  ;;  %v3025_v7 = vpack.c.bf16 %v203_v62, %v200_v61  ;;  %v202_v10 = vld [vmem:[#allocation7 + $0x138] sm:$0xff]  ;;  %v209_v14 = vld [vmem:[#allocation7 + $0x170] sm:$0xff] }
  0xa1   :  { %2086 = vmatprep.subr.bf16.mxu0 %v2989_v36  ;;  %2052 = vmatpush1.bf16.msra.mxu1 %v2992_v37  ;;  %v199_v9 = vld [vmem:[#allocation7 + $0x120] sm:$0xff]  ;;  %v206_v11 = vld [vmem:[#allocation7 + $0x158] sm:$0xff]  ;;  %v3029_v15 = vpack.c.bf16 %v210_v6, %v207_v5  ;;  %v205_v20 = vld [vmem:[#allocation7 + $0x150] sm:$0xff] }
  0xa2   :  { %2054 = vmatprep.subr.bf16.mxu1 %v2995_v40  ;;  %v3032_v17 = vpack.c.bf16 %v202_v10, %v199_v9  ;;  %v3035_v18 = vpack.c.bf16 %v209_v14, %v206_v11  ;;  %v208_v21 = vld [vmem:[#allocation7 + $0x168] sm:$0xff]  ;;  %v215_v25 = vld [vmem:[#allocation8 + $0x20] sm:$0xff]  ;;  %v213_v30 = vld [vmem:[#allocation8 + $0x10] sm:$0xff] }
  0xa3   :  { %v3040_v23 = vpack.c.bf16 %v208_v21, %v205_v20  ;;  %v212_v24 = vld [vmem:[#allocation8 + $0x8] sm:$0xff]  ;;  %v211_v34 = vld [vmem:[#allocation8] sm:$0xff]  ;;  %v214_v35 = vld [vmem:[#allocation8 + $0x18] sm:$0xff] }
  0xa4   :  { %2088 = vmatpush3.bf16.msra.mxu0 %v2989_v36  ;;  %v3045_v26 = vpack.c.bf16 %v215_v25, %v212_v24  ;;  %v216_v32 = vld [vmem:[#allocation8 + $0x28] sm:$0xff]  ;;  %v218_v38 = vld [vmem:[#allocation8 + $0x38] sm:$0xff]  ;;  %v221_v39 = vld [vmem:[#allocation8 + $0x50] sm:$0xff]  ;;  %v3052_v41 = vpack.c.bf16 %v214_v35, %v211_v34 }
  0xa5   :  { %2090 = vmatprep.subr.bf16.mxu0 %v2999_v45  ;;  %2056 = vmatpush1.bf16.msra.mxu1 %v3002_v46  ;;  %v3049_v33 = vpack.c.bf16 %v216_v32, %v213_v30  ;;  %v219_v42 = vld [vmem:[#allocation8 + $0x40] sm:$0xff]  ;;  %v222_v43 = vld [vmem:[#allocation8 + $0x58] sm:$0xff]  ;;  %v3054_v47 = vpack.c.bf16 %v221_v39, %v218_v38  ;;  %v217_v48 = vld [vmem:[#allocation8 + $0x30] sm:$0xff] }
  0xa6   :  { %2058 = vmatprep.subr.bf16.mxu1 %v3005_v49  ;;  %v220_v50 = vld [vmem:[#allocation8 + $0x48] sm:$0xff]  ;;  %v227_v53 = vld [vmem:[#allocation8 + $0x80] sm:$0xff]  ;;  %v3056_v56 = vpack.c.bf16 %v222_v43, %v219_v42  ;;  %v225_v59 = vld [vmem:[#allocation8 + $0x70] sm:$0xff] }
  0xa7   :  { %v224_v52 = vld [vmem:[#allocation8 + $0x68] sm:$0xff]  ;;  %v3059_v57 = vpack.c.bf16 %v220_v50, %v217_v48  ;;  %v223_v62 = vld [vmem:[#allocation8 + $0x60] sm:$0xff]  ;;  %v226_v5 = vld [vmem:[#allocation8 + $0x78] sm:$0xff] }
  0xa8   :  { %2092 = vmatpush3.bf16.msra.mxu0 %v2999_v45  ;;  %v228_v60 = vld [vmem:[#allocation8 + $0x88] sm:$0xff]  ;;  %v3063_v61 = vpack.c.bf16 %v227_v53, %v224_v52  ;;  %v230_v6 = vld [vmem:[#allocation8 + $0x98] sm:$0xff]  ;;  %v233_v9 = vld [vmem:[#allocation8 + $0xb0] sm:$0xff]  ;;  %v3071_v11 = vpack.c.bf16 %v226_v5, %v223_v62 }
  0xa9   :  { %2094 = vmatprep.subr.bf16.mxu0 %v3009_v54  ;;  %2060 = vmatpush1.bf16.msra.mxu1 %v3012_v55  ;;  %v3068_v10 = vpack.c.bf16 %v228_v60, %v225_v59  ;;  %v231_v14 = vld [vmem:[#allocation8 + $0xa0] sm:$0xff]  ;;  %v234_v20 = vld [vmem:[#allocation8 + $0xb8] sm:$0xff]  ;;  %v3075_v21 = vpack.c.bf16 %v233_v9, %v230_v6  ;;  %v229_v24 = vld [vmem:[#allocation8 + $0x90] sm:$0xff] }
  0xaa   :  { %2062 = vmatprep.subr.bf16.mxu1 %v3015_v58  ;;  %v232_v25 = vld [vmem:[#allocation8 + $0xa8] sm:$0xff]  ;;  %v239_v32 = vld [vmem:[#allocation8 + $0xe0] sm:$0xff]  ;;  %v3079_v34 = vpack.c.bf16 %v234_v20, %v231_v14  ;;  %v237_v38 = vld [vmem:[#allocation8 + $0xd0] sm:$0xff] }
  0xab   :  { %v236_v30 = vld [vmem:[#allocation8 + $0xc8] sm:$0xff]  ;;  %v3082_v35 = vpack.c.bf16 %v232_v25, %v229_v24  ;;  %v235_v43 = vld [vmem:[#allocation8 + $0xc0] sm:$0xff]  ;;  %v242_v48 = vld [vmem:[#allocation8 + $0xf8] sm:$0xff] }
  0xac   :  { %2096 = vmatpush3.bf16.msra.mxu0 %v3009_v54  ;;  %v240_v39 = vld [vmem:[#allocation8 + $0xe8] sm:$0xff]  ;;  %v3085_v42 = vpack.c.bf16 %v239_v32, %v236_v30  ;;  %v245_v50 = vld [vmem:[#allocation8 + $0x110] sm:$0xff]  ;;  %v243_v53 = vld [vmem:[#allocation8 + $0x100] sm:$0xff] }
  0xad   :  { %2098 = vmatprep.subr.bf16.mxu0 %v3019_v63  ;;  %2064 = vmatpush1.bf16.msra.mxu1 %v3022_v3  ;;  %v246_v59 = vld [vmem:[#allocation8 + $0x118] sm:$0xff]  ;;  %v3095_v60 = vpack.c.bf16 %v245_v50, %v242_v48  ;;  %v241_v62 = vld [vmem:[#allocation8 + $0xf0] sm:$0xff]  ;;  %v244_v5 = vld [vmem:[#allocation8 + $0x108] sm:$0xff] }
  0xae   :  { %2066 = vmatprep.subr.bf16.mxu1 %v3025_v7  ;;  %v248_v6 = vld [vmem:[#allocation8 + $0x128] sm:$0xff]  ;;  %v251_v9 = vld [vmem:[#allocation8 + $0x140] sm:$0xff]  ;;  %v3099_v14 = vpack.c.bf16 %v246_v59, %v243_v53  ;;  %v3102_v20 = vpack.c.bf16 %v244_v5, %v241_v62  ;;  %v249_v24 = vld [vmem:[#allocation8 + $0x130] sm:$0xff] }
  0xaf   :  { %v252_v25 = vld [vmem:[#allocation8 + $0x148] sm:$0xff]  ;;  %v3105_v30 = vpack.c.bf16 %v251_v9, %v248_v6  ;;  %v247_v32 = vld [vmem:[#allocation8 + $0x120] sm:$0xff]  ;;  %v258_v53 = vld [vmem:[#allocation8 + $0x178] sm:$0xff] }
  0xb0   :  { %2100 = vmatpush3.bf16.msra.mxu0 %v3019_v63  ;;  %v255_v50 = vld [vmem:[#allocation8 + $0x160] sm:$0xff]  ;;  %v253_v62 = vld [vmem:[#allocation8 + $0x150] sm:$0xff]  ;;  %v256_v5 = vld [vmem:[#allocation8 + $0x168] sm:$0xff] }
  0xb1   :  { %2102 = vmatprep.subr.bf16.mxu0 %v3029_v15  ;;  %2068 = vmatpush1.bf16.msra.mxu1 %v3032_v17  ;;  %v3119_v6 = vpack.c.bf16 %v258_v53, %v255_v50  ;;  %v3122_v9 = vpack.c.bf16 %v256_v5, %v253_v62 }
  0xb2   :  { %2070 = vmatprep.subr.bf16.mxu1 %v3035_v18 }
  0xb4   :  { %2104 = vmatpush3.bf16.msra.mxu0 %v3029_v15 }
  0xb5   :  { %2072 = vmatpush1.bf16.msra.mxu1 %v3040_v23  ;;  %2138 = vmatprep.subr.bf16.mxu0 %v3049_v33 }
  0xb6   :  { %2106 = vmatprep.subr.bf16.mxu1 %v3045_v26 }
 0x16b   :  { %v1749_v44 = vpop.f32.mrb[0].mxu1 }
 0x16c   :  { %v334_v51 = vpop.f32.mrb[1].mxu1 }
 0x16d   :  { %424 = vmatmul.mubr.f32.vlgmr.msra.gmra.mrb[2].mxu1 %v334_v51  ;;  %1782 = vmatprep.mubr.f32.mxu0 %v334_v51  ;;  %v3089_v51 = vpack.c.bf16 %v240_v39, %v237_v38  ;;  %v250_v38 = vld [vmem:[#allocation8 + $0x138] sm:$0xff] }
 0x16e   :  { %2108 = vmatpush1.bf16.msra.mxu1 %v3052_v41  ;;  %1783 = vmatmul.mubr.f32.vlgmr.msra.gmra.mrb[0].mxu0 %v1749_v44  ;;  %v254_v39 = vld [vmem:[#allocation8 + $0x158] sm:$0xff]  ;;  %v3112_v48 = vpack.c.bf16 %v250_v38, %v247_v32 }
 0x16f   :  { %429 = vmatprep.mubr.f32.mxu1 %v2741_v29  ;;  %2110 = vmatprep.subr.bf16.mxu1 %v3054_v47 }
 0x170   :  { %2140 = vmatpush3.bf16.msra.mxu0 %v3049_v33  ;;  %1817 = vmatprep.mubr.f32.mxu0 %v2949_v0 }
 0x171   :  { %430 = vmatmul.mubr.f32.gmra.mrb[4].mxu1 %v1749_v44  ;;  %2142 = vmatprep.subr.bf16.mxu0 %v3056_v56  ;;  %v238_v44 = vld [vmem:[#allocation8 + $0xd8] sm:$0xff] }
 0x172   :  { %2112 = vmatpush1.bf16.msra.mxu1 %v3059_v57  ;;  %591 = vmatprep.mubr.f32.mxu1 %v2741_v29  ;;  %v3092_v52 = vpack.c.bf16 %v238_v44, %v235_v43  ;;  %v257_v43 = vld [vmem:[#allocation8 + $0x170] sm:$0xff]  ;;  %v3109_v44 = vpack.c.bf16 %v252_v25, %v249_v24 }
 0x173   :  { %2114 = vmatprep.subr.bf16.mxu1 %v3063_v61  ;;  %v3115_v59 = vpack.c.bf16 %v257_v43, %v254_v39 }
 0x174   :  { %2144 = vmatpush3.bf16.msra.mxu0 %v3056_v56 }
 0x175   :  { %2146 = vmatprep.subr.bf16.mxu0 %v3068_v10 }
 0x176   :  { %2116 = vmatpush1.bf16.msra.mxu1 %v3071_v11 }
 0x177   :  { %2118 = vmatprep.subr.bf16.mxu1 %v3075_v21 }
 0x178   :  { %2148 = vmatpush3.bf16.msra.mxu0 %v3068_v10 }
 0x179   :  { %2150 = vmatprep.subr.bf16.mxu0 %v3079_v34 }
 0x17a   :  { %2120 = vmatpush1.bf16.msra.mxu1 %v3082_v35 }
 0x17b   :  { %2122 = vmatprep.subr.bf16.mxu1 %v3085_v42 }
 0x17c   :  { %2152 = vmatpush3.bf16.msra.mxu0 %v3079_v34 }
 0x17d   :  { %2154 = vmatprep.subr.bf16.mxu0 %v3089_v51 }
 0x17e   :  { %2124 = vmatpush1.bf16.msra.mxu1 %v3092_v52 }
 0x17f   :  { %2126 = vmatprep.subr.bf16.mxu1 %v3095_v60 }
 0x180   :  { %2156 = vmatpush3.bf16.msra.mxu0 %v3089_v51 }
 0x181   :  { %2158 = vmatprep.subr.bf16.mxu0 %v3099_v14 }
 0x182   :  { %2128 = vmatpush1.bf16.msra.mxu1 %v3102_v20 }
 0x183   :  { %2130 = vmatprep.subr.bf16.mxu1 %v3105_v30 }
 0x184   :  { %2160 = vmatpush3.bf16.msra.mxu0 %v3099_v14 }
 0x185   :  { %2162 = vmatprep.subr.bf16.mxu0 %v3109_v44 }
 0x186   :  { %2132 = vmatpush1.bf16.msra.mxu1 %v3112_v48 }
 0x187   :  { %2134 = vmatprep.subr.bf16.mxu1 %v3115_v59 }
 0x188   :  { %2164 = vmatpush3.bf16.msra.mxu0 %v3109_v44 }
 0x189   :  { %2166 = vmatprep.subr.bf16.mxu0 %v3119_v6 }
 0x18a   :  { %2136 = vmatpush1.bf16.msra.mxu1 %v3122_v9 }
 0x18b   :  { %2174 = vmatprep.subr.bf16.mxu1 %v2958_v8 }
 0x18c   :  { %2168 = vmatpush3.bf16.msra.mxu0 %v3119_v6 }
 0x18d   :  { %592 = vmatmul.mubr.f32.vlgmr.msra.gmra.mrb[2].mxu1 %v2949_v0 }
 0x18e   :  { %597 = vmatprep.mubr.f32.mxu1 %v2741_v29  ;;  %2176 = vmatpush1.bf16.msra.mxu1 %v2966_v16  ;;  %v344_v16 = vlaneseq }
 0x18f   :  { %1818 = vmatmul.mubr.f32.vlgmr.msra.gmra.mrb[2].mxu0 %v2951_v1  ;;  %2178 = vmatprep.subr.bf16.mxu1 %v2970_v19 }
 0x190   :  { %1824 = vmatprep.mubr.msk.f32.mxu0 %vm261_vm0, %v1589_v4  ;;  %v345_v19 = vshrl.u32 %v344_v16, 7 }
 0x191   :  { %598 = vmatmul.mubr.f32.gmra.mrb[4].mxu1 %v2951_v1 }
 0x192   :  { %2180 = vmatpush1.bf16.msra.mxu1 %v2982_v28  ;;  %850 = vmatprep.mubr.f32.mxu1 %v2741_v29  ;;  %v346_v28 = vsub.s32 0, %v345_v19  ;;  %v354_v50 = vsub.s32 2, %v345_v19 }
 0x193   :  { %2182 = vmatprep.subr.bf16.mxu1 %v2985_v31  ;;  %v260_v31 = vld [vmem:[%s3285_s5] sm:$0x7] }
 0x194   :  { %v3167_v62 = vrot.slane %v260_v31, %v354_v50 }
 0x196   :  { %2184 = vmatpush1.bf16.msra.mxu1 %v2992_v37  ;;  %v259_v37 = vld [vmem:[%s3284_s4] sm:$0x7] }
 0x197   :  { %2186 = vmatprep.subr.bf16.mxu1 %v2995_v40  ;;  %v347_v40 = vrot.slane %v259_v37, %v346_v28 }
 0x19a   :  { %2188 = vmatpush1.bf16.msra.mxu1 %v3002_v46  ;;  %v515_v46 = vrot.slane %v260_v31, %v346_v28 }
 0x19b   :  { %2190 = vmatprep.subr.bf16.mxu1 %v3005_v49 }
 0x19c   :  { %v3160_v49 = vadd.f32 %v515_v46, %v347_v40  ;;  %v3170_v40 = vrot.slane %v259_v37, %v354_v50 }
 0x19e   :  { %2192 = vmatpush1.bf16.msra.mxu1 %v3012_v55  ;;  %v350_v55 = vsub.s32 1, %v345_v19 }
 0x19f   :  { %2194 = vmatprep.subr.bf16.mxu1 %v3015_v58 }
 0x1a2   :  { %2196 = vmatpush1.bf16.msra.mxu1 %v3022_v3 }
 0x1a3   :  { %2198 = vmatprep.subr.bf16.mxu1 %v3025_v7 }
 0x1a6   :  { %2200 = vmatpush1.bf16.msra.mxu1 %v3032_v17  ;;  %v351_v17 = vrot.slane %v259_v37, %v350_v55 }
 0x1a7   :  { %2202 = vmatprep.subr.bf16.mxu1 %v3035_v18  ;;  %v519_v18 = vrot.slane %v260_v31, %v350_v55 }
 0x1a9   :  { %v3164_v39 = vadd.f32 %v519_v18, %v351_v17 }
 0x1aa   :  { %2204 = vmatpush1.bf16.msra.mxu1 %v3040_v23 }
 0x1ab   :  { %2238 = vmatprep.subr.bf16.mxu1 %v3045_v26 }
 0x241   :  { %v1784_v4 = vpop.f32.mrb[0].mxu0 }
 0x242   :  { %v502_v8 = vpop.f32.mrb[1].mxu0 }
 0x243   :  { %v503_v18 = vadd.f32 %v502_v8, %v3170_v40 }
 0x260   :  { %v593_v58 = vpop.f32.mrb[2].mxu1 }
 0x261   :  { %v2430_v3 = vadd.f32 %v3160_v49, %v593_v58  ;;  %v595_v7 = vpop.f32.mrb[3].mxu1 }
 0x262   :  { %v1819_v23 = vpop.f32.mrb[2].mxu0  ;;  %v2432_v53 = vadd.f32 %v3164_v39, %v595_v7 }
 0x263   :  { %v681_v26 = vmul.f32 0.5, %v2430_v3  ;;  %v670_v24 = vpop.f32.mrb[3].mxu0  ;;  %v676_v7 = vadd.f32 %v1819_v23, %v3167_v62 }
 0x264   :  { %v599_v25 = vpop.f32.mrb[4].mxu1  ;;  %v691_v5 = vmul.f32 0.5, %v2432_v53  ;;  %v671_v55 = vadd.f32 %v670_v24, %v3167_v62 }
 0x265   :  { %2471 = vtanh.f32 %v681_v26  ;;  %v2434_v32 = vadd.f32 %v3160_v49, %v599_v25  ;;  %v601_v38 = vpop.f32.mrb[5].mxu1 }
 0x266   :  { %v2436_v16 = vadd.f32 %v3164_v39, %v601_v38 }
 0x267   :  { %v682_v43 = vmul.f32 0.5, %v2434_v32  ;;  %v508_v32 = vadd.f32 %v1784_v4, %v3170_v40 }
 0x268   :  { %v692_v58 = vmul.f32 0.5, %v2436_v16 }
 0x269   :  { %2473 = vtanh.f32 %v682_v43 }
 0x26a   :  { %2475 = vtanh.f32 %v691_v5 }
 0x26b   :  { %2477 = vtanh.f32 %v692_v58 }
 0x26f   :  { %v2472_v28 = vpop.eup %2471 }
 0x270   :  { %v685_v46 = vadd.f32 1.0, %v2472_v28 }
 0x272   :  { %v687_v3 = vmul.f32 0.5, %v685_v46 }
 0x273   :  { %v2474_v17 = vpop.eup %2473 }
 0x274   :  { %v686_v19 = vadd.f32 1.0, %v2474_v17  ;;  %v699_v31 = vmul.f32 %v687_v3, %v671_v55  ;;  %v2476_v43 = vpop.eup %2475 }
 0x275   :  { %v695_v24 = vadd.f32 1.0, %v2476_v43  ;;  %v2478_v50 = vpop.eup %2477  ;;  %v1135_v43 = vld [vmem:[#allocation10 + $0x68] sm:$0xff] }
 0x276   :  { %v688_v26 = vmul.f32 0.5, %v686_v19  ;;  %v701_v25 = vadd.f32 %v699_v31, %v503_v18  ;;  %v696_v16 = vadd.f32 1.0, %v2478_v50  ;;  %v1128_v18 = vld [vmem:[#allocation10 + $0x30] sm:$0xff]  ;;  %v1129_v19 = vld [vmem:[#allocation10 + $0x38] sm:$0xff]  ;;  %v1130_v31 = vld [vmem:[#allocation10 + $0x40] sm:$0xff] }
 0x277   :  { %v697_v5 = vmul.f32 0.5, %v695_v24  ;;  %v1136_v50 = vld [vmem:[#allocation10 + $0x70] sm:$0xff] }
 0x278   :  { %v700_v37 = vmul.f32 %v688_v26, %v676_v7  ;;  %2479 = vtanh.f32 %v701_v25  ;;  %v698_v46 = vmul.f32 0.5, %v696_v16  ;;  %v2345_v7 = vpack.c.bf16 %v1129_v19, %v1128_v18  ;;  %v1131_v26 = vld [vmem:[#allocation10 + $0x48] sm:$0xff]  ;;  %v1321_v16 = vld [vmem:[#allocation13] sm:$0xff] }
 0x279   :  { %v2349_v25 = vpack.c.bf16 %v1131_v26, %v1130_v31 }
 0x27a   :  { %v702_v38 = vadd.f32 %v700_v37, %v508_v32  ;;  %v1133_v32 = vld [vmem:[#allocation10 + $0x58] sm:$0xff] }
 0x27c   :  { %2481 = vtanh.f32 %v702_v38  ;;  %v1134_v38 = vld [vmem:[#allocation10 + $0x60] sm:$0xff] }
 0x27d   :  { %v2357_v24 = vpack.c.bf16 %v1135_v43, %v1134_v38  ;;  %v1329_v38 = vld [vmem:[#allocation13 + $0x40] sm:$0xff]  ;;  %v1330_v43 = vld [vmem:[#allocation13 + $0x48] sm:$0xff] }
 0x282   :  { %v2480_v53 = vpop.eup %2479 }
 0x283   :  { %v705_v8 = vsub.f32 %v2949_v0, %v2480_v53 }
 0x285   :  { %v707_v28 = vmul.f32 %v705_v8, %v697_v5  ;;  %v1322_v8 = vld [vmem:[#allocation13 + $0x8] sm:$0xff] }
 0x286   :  { %v2482_v23 = vpop.eup %2481 }
 0x287   :  { %v706_v55 = vsub.f32 %v2951_v1, %v2482_v23  ;;  %v3178_v58 = vadd.f32 %v2480_v53, %v707_v28  ;;  %v1137_v53 = vld [vmem:[#allocation10 + $0x78] sm:$0xff]  ;;  %v1323_v28 = vld [vmem:[#allocation13 + $0x10] sm:$0xff] }
 0x288   :  { %v2361_v5 = vpack.c.bf16 %v1137_v53, %v1136_v50  ;;  %v1332_v50 = vld [vmem:[#allocation13 + $0x58] sm:$0xff] }
 0x289   :  { %v708_v4 = vmul.f32 %v706_v55, %v698_v46  ;;  %v1324_v46 = vld [vmem:[#allocation13 + $0x18] sm:$0xff] }
 0x28a   :  { %v2369_v55 = vpack.c.bf16 %v1324_v46, %v1323_v28  ;;  %v1336_v28 = vld [vmem:[#allocation13 + $0x78] sm:$0xff]  ;;  %v1448_v46 = vld [vmem:[#allocation14] sm:$0xff] }
 0x28b   :  { %v3180_v3 = vadd.f32 %v2482_v23, %v708_v4  ;;  %v2365_v23 = vpack.c.bf16 %v1322_v8, %v1321_v16  ;;  %v1325_v4 = vld [vmem:[#allocation13 + $0x20] sm:$0xff]  ;;  %v1335_v8 = vld [vmem:[#allocation13 + $0x70] sm:$0xff] }
 0x28d   :  { %v2169_v17 = vpack.c.bf16 %v3180_v3, %v3178_v58 }
 0x28f   :  { %2170 = vmatprep.subr.bf16.mxu0 %v2169_v17 }
 0x290   :  { %2172 = vmatpush3.bf16.msra.mxu0 %v2169_v17  ;;  %v1326_v17 = vld [vmem:[#allocation13 + $0x28] sm:$0xff] }
 0x291   :  { %2206 = vmatprep.subr.bf16.mxu0 %v2964_v13 }
 0x293   :  { %1825 = vmatmul.mubr.msk.f32.vlgmr.msra.gmra.mrb[4].mxu0 %vm261_vm0, %v1590_v12 }
 0x294   :  { %2208 = vmatpush3.bf16.msra.mxu0 %v2964_v13  ;;  %v1138_v13 = vld [vmem:[#allocation11] sm:$0xff] }
 0x295   :  { %2210 = vmatprep.subr.bf16.mxu0 %v2972_v22 }
 0x298   :  { %2212 = vmatpush3.bf16.msra.mxu0 %v2972_v22  ;;  %v1139_v22 = vld [vmem:[#allocation11 + $0x8] sm:$0xff] }
 0x299   :  { %2214 = vmatprep.subr.bf16.mxu0 %v2979_v27 }
 0x29c   :  { %2216 = vmatpush3.bf16.msra.mxu0 %v2979_v27  ;;  %v1140_v27 = vld [vmem:[#allocation11 + $0x10] sm:$0xff] }
 0x29d   :  { %2218 = vmatprep.subr.bf16.mxu0 %v2989_v36 }
 0x2a0   :  { %2220 = vmatpush3.bf16.msra.mxu0 %v2989_v36  ;;  %v2301_v36 = vpack.c.bf16 %v1139_v22, %v1138_v13 }
 0x2a1   :  { %2222 = vmatprep.subr.bf16.mxu0 %v2999_v45 }
 0x2a4   :  { %2224 = vmatpush3.bf16.msra.mxu0 %v2999_v45  ;;  %v1141_v45 = vld [vmem:[#allocation11 + $0x18] sm:$0xff] }
 0x2a5   :  { %2226 = vmatprep.subr.bf16.mxu0 %v3009_v54 }
 0x2a8   :  { %2228 = vmatpush3.bf16.msra.mxu0 %v3009_v54  ;;  %v2305_v54 = vpack.c.bf16 %v1141_v45, %v1140_v27 }
 0x2a9   :  { %2230 = vmatprep.subr.bf16.mxu0 %v3019_v63 }
 0x2ac   :  { %2232 = vmatpush3.bf16.msra.mxu0 %v3019_v63  ;;  %v1142_v63 = vld [vmem:[#allocation11 + $0x20] sm:$0xff] }
 0x2ad   :  { %2234 = vmatprep.subr.bf16.mxu0 %v3029_v15 }
 0x2b0   :  { %2236 = vmatpush3.bf16.msra.mxu0 %v3029_v15  ;;  %v1143_v15 = vld [vmem:[#allocation11 + $0x28] sm:$0xff] }
 0x2b1   :  { %2270 = vmatprep.subr.bf16.mxu0 %v3049_v33 }
 0x366   :  { %v1826_v2 = vpop.f32.mrb[4].mxu0 }
 0x367   :  { %v777_v12 = vpop.f32.mrb[5].mxu0 }
 0x368   :  { %851 = vmatmul.mubr.f32.vlgmr.msra.gmra.mrb[6].mxu1 %v777_v12  ;;  %1859 = vmatprep.mubr.f32.mxu0 %v777_v12 }
 0x369   :  { %2240 = vmatpush1.bf16.msra.mxu1 %v3052_v41  ;;  %1860 = vmatmul.mubr.f32.vlgmr.msra.gmra.mrb[6].mxu0 %v1826_v2  ;;  %v1144_v41 = vld [vmem:[#allocation11 + $0x30] sm:$0xff] }
 0x36a   :  { %2272 = vmatpush3.bf16.msra.mxu0 %v3049_v33  ;;  %1894 = vmatprep.mubr.f32.mxu0 %v3178_v58  ;;  %v2309_v33 = vpack.c.bf16 %v1143_v15, %v1142_v63 }
 0x36b   :  { %856 = vmatprep.mubr.f32.mxu1 %v2741_v29  ;;  %2242 = vmatprep.subr.bf16.mxu1 %v3054_v47  ;;  %v1145_v47 = vld [vmem:[#allocation11 + $0x38] sm:$0xff] }
 0x36c   :  { %857 = vmatmul.mubr.f32.gmra.mrb[8].mxu1 %v1826_v2  ;;  %2274 = vmatprep.subr.bf16.mxu0 %v3056_v56  ;;  %v2373_v2 = vpack.c.bf16 %v1326_v17, %v1325_v4  ;;  %v1583_v17 = vld [vmem:[%s3288_s8] ss:$0 sm:$0xff] }
 0x36d   :  { %2244 = vmatpush1.bf16.msra.mxu1 %v3059_v57  ;;  %1002 = vmatprep.mubr.f32.mxu1 %v2741_v29  ;;  %v1147_v57 = vld [vmem:[#allocation11 + $0x48] sm:$0xff] }
 0x36e   :  { %2276 = vmatpush3.bf16.msra.mxu0 %v3056_v56  ;;  %2246 = vmatprep.subr.bf16.mxu1 %v3063_v61  ;;  %v1146_v56 = vld [vmem:[#allocation11 + $0x40] sm:$0xff]  ;;  %v1148_v61 = vld [vmem:[#allocation11 + $0x50] sm:$0xff] }
 0x36f   :  { %2278 = vmatprep.subr.bf16.mxu0 %v3068_v10 }
 0x371   :  { %2248 = vmatpush1.bf16.msra.mxu1 %v3071_v11 }
 0x372   :  { %2280 = vmatpush3.bf16.msra.mxu0 %v3068_v10  ;;  %2250 = vmatprep.subr.bf16.mxu1 %v3075_v21  ;;  %v1149_v10 = vld [vmem:[#allocation11 + $0x58] sm:$0xff]  ;;  %v1150_v21 = vld [vmem:[#allocation11 + $0x60] sm:$0xff] }
 0x373   :  { %2282 = vmatprep.subr.bf16.mxu0 %v3079_v34  ;;  %v2321_v11 = vpack.c.bf16 %v1149_v10, %v1148_v61 }
 0x375   :  { %2252 = vmatpush1.bf16.msra.mxu1 %v3082_v35 }
 0x376   :  { %2284 = vmatpush3.bf16.msra.mxu0 %v3079_v34  ;;  %2254 = vmatprep.subr.bf16.mxu1 %v3085_v42  ;;  %v1151_v34 = vld [vmem:[#allocation11 + $0x68] sm:$0xff]  ;;  %v1152_v42 = vld [vmem:[#allocation11 + $0x70] sm:$0xff] }
 0x377   :  { %2286 = vmatprep.subr.bf16.mxu0 %v3089_v51  ;;  %v2325_v35 = vpack.c.bf16 %v1151_v34, %v1150_v21 }
 0x379   :  { %2256 = vmatpush1.bf16.msra.mxu1 %v3092_v52 }
 0x37a   :  { %2288 = vmatpush3.bf16.msra.mxu0 %v3089_v51  ;;  %2258 = vmatprep.subr.bf16.mxu1 %v3095_v60  ;;  %v1153_v51 = vld [vmem:[#allocation11 + $0x78] sm:$0xff]  ;;  %v1122_v60 = vld [vmem:[#allocation10] sm:$0xff] }
 0x37b   :  { %2290 = vmatprep.subr.bf16.mxu0 %v3099_v14  ;;  %v2329_v52 = vpack.c.bf16 %v1153_v51, %v1152_v42 }
 0x37d   :  { %2260 = vmatpush1.bf16.msra.mxu1 %v3102_v20 }
 0x37e   :  { %2292 = vmatpush3.bf16.msra.mxu0 %v3099_v14  ;;  %2262 = vmatprep.subr.bf16.mxu1 %v3105_v30  ;;  %v1123_v14 = vld [vmem:[#allocation10 + $0x8] sm:$0xff]  ;;  %v1124_v30 = vld [vmem:[#allocation10 + $0x10] sm:$0xff] }
 0x37f   :  { %2294 = vmatprep.subr.bf16.mxu0 %v3109_v44  ;;  %v2333_v20 = vpack.c.bf16 %v1123_v14, %v1122_v60 }
 0x381   :  { %2264 = vmatpush1.bf16.msra.mxu1 %v3112_v48 }
 0x382   :  { %2296 = vmatpush3.bf16.msra.mxu0 %v3109_v44  ;;  %2266 = vmatprep.subr.bf16.mxu1 %v3115_v59  ;;  %v1125_v44 = vld [vmem:[#allocation10 + $0x18] sm:$0xff]  ;;  %v1126_v59 = vld [vmem:[#allocation10 + $0x20] sm:$0xff] }
 0x383   :  { %2298 = vmatprep.subr.bf16.mxu0 %v3119_v6  ;;  %v2337_v48 = vpack.c.bf16 %v1125_v44, %v1124_v30 }
 0x385   :  { %2268 = vmatpush1.bf16.msra.mxu1 %v3122_v9 }
 0x386   :  { %2300 = vmatpush3.bf16.msra.mxu0 %v3119_v6  ;;  %2302 = vmatprep.subr.bf16.mxu1 %v2301_v36  ;;  %v1127_v6 = vld [vmem:[#allocation10 + $0x28] sm:$0xff] }
 0x387   :  { %v2341_v9 = vpack.c.bf16 %v1127_v6, %v1126_v59  ;;  %2366 = vmatprep.subr.bf16.mxu0 %v2365_v23 }
 0x388   :  { %1003 = vmatmul.mubr.f32.vlgmr.msra.gmra.mrb[6].mxu1 %v3178_v58 }
 0x389   :  { %1895 = vmatmul.mubr.f32.vlgmr.msra.gmra.mrb[8].mxu0 %v3180_v3  ;;  %1008 = vmatprep.mubr.f32.mxu1 %v2741_v29  ;;  %v2313_v29 = vpack.c.bf16 %v1145_v47, %v1144_v41 }
 0x38a   :  { %2304 = vmatpush3.bf16.msra.mxu1 %v2301_v36  ;;  %2368 = vmatpush3.bf16.msra.mxu0 %v2365_v23  ;;  %v2393_v23 = vpack.c.bf16 %v1336_v28, %v1335_v8  ;;  %v1586_v8 = vld [vmem:[%s3292_s12] ss:$0 sm:$0xff]  ;;  %s2742_s12 = smov [#allocation16]  }
 0x38b   :  { %2306 = vmatprep.subr.bf16.mxu1 %v2305_v54  ;;  %2370 = vmatprep.subr.bf16.mxu0 %v2369_v55 }
 0x38c   :  { %1009 = vmatmul.mubr.f32.gmra.mrb[8].mxu1 %v3180_v3 }
 0x38d   :  { %1929 = vmatprep.mubr.f32.mxu1 %v2949_v0  ;;  %v2317_v0 = vpack.c.bf16 %v1147_v57, %v1146_v56 }
 0x38e   :  { %2308 = vmatpush3.bf16.msra.mxu1 %v2305_v54  ;;  %2372 = vmatpush3.bf16.msra.mxu0 %v2369_v55  ;;  %v1449_v55 = vld [vmem:[#allocation14 + $0x8] sm:$0xff] }
 0x38f   :  { %2310 = vmatprep.subr.bf16.mxu1 %v2309_v33  ;;  %2374 = vmatprep.subr.bf16.mxu0 %v2373_v2  ;;  %v2397_v4 = vpack.c.bf16 %v1449_v55, %v1448_v46 }
 0x392   :  { %2312 = vmatpush3.bf16.msra.mxu1 %v2309_v33  ;;  %2376 = vmatpush3.bf16.msra.mxu0 %v2373_v2 }
 0x393   :  { %2314 = vmatprep.subr.bf16.mxu1 %v2313_v29 }
 0x396   :  { %2316 = vmatpush3.bf16.msra.mxu1 %v2313_v29 }
 0x397   :  { %2318 = vmatprep.subr.bf16.mxu1 %v2317_v0 }
 0x39a   :  { %2320 = vmatpush3.bf16.msra.mxu1 %v2317_v0 }
 0x39b   :  { %2322 = vmatprep.subr.bf16.mxu1 %v2321_v11 }
 0x39e   :  { %2324 = vmatpush3.bf16.msra.mxu1 %v2321_v11 }
 0x39f   :  { %2326 = vmatprep.subr.bf16.mxu1 %v2325_v35 }
 0x3a2   :  { %2328 = vmatpush3.bf16.msra.mxu1 %v2325_v35 }
 0x3a3   :  { %2330 = vmatprep.subr.bf16.mxu1 %v2329_v52 }
 0x3a6   :  { %2332 = vmatpush3.bf16.msra.mxu1 %v2329_v52 }
 0x3a7   :  { %2334 = vmatprep.subr.bf16.mxu1 %v2333_v20 }
 0x3a9   :  { %1930 = vmatmul.mubr.f32.vlgmr.msra.gmra.mrb[10].mxu1 %v2951_v1  ;;  %v1132_v1 = vld [vmem:[#allocation10 + $0x50] sm:$0xff] }
 0x3aa   :  { %2336 = vmatpush3.bf16.msra.mxu1 %v2333_v20  ;;  %v2353_v37 = vpack.c.bf16 %v1133_v32, %v1132_v1  ;;  %v1327_v1 = vld [vmem:[#allocation13 + $0x30] sm:$0xff]  ;;  %v1328_v32 = vld [vmem:[#allocation13 + $0x38] sm:$0xff] }
 0x3ab   :  { %2338 = vmatprep.subr.bf16.mxu1 %v2337_v48 }
 0x3ae   :  { %2340 = vmatpush3.bf16.msra.mxu1 %v2337_v48 }
 0x3af   :  { %2342 = vmatprep.subr.bf16.mxu1 %v2341_v9 }
 0x3b2   :  { %2344 = vmatpush3.bf16.msra.mxu1 %v2341_v9 }
 0x3b3   :  { %2346 = vmatprep.subr.bf16.mxu1 %v2345_v7 }
 0x3b6   :  { %2348 = vmatpush3.bf16.msra.mxu1 %v2345_v7 }
 0x3b7   :  { %2350 = vmatprep.subr.bf16.mxu1 %v2349_v25 }
 0x3ba   :  { %2352 = vmatpush3.bf16.msra.mxu1 %v2349_v25 }
 0x3bb   :  { %2354 = vmatprep.subr.bf16.mxu1 %v2353_v37 }
 0x3be   :  { %2356 = vmatpush3.bf16.msra.mxu1 %v2353_v37  ;;  %v2377_v37 = vpack.c.bf16 %v1328_v32, %v1327_v1 }
 0x3bf   :  { %2358 = vmatprep.subr.bf16.mxu1 %v2357_v24 }
 0x3c0   :  { %2378 = vmatprep.subr.bf16.mxu0 %v2377_v37 }
 0x3c1   :  { %2380 = vmatpush3.bf16.msra.mxu0 %v2377_v37 }
 0x3c2   :  { %2360 = vmatpush3.bf16.msra.mxu1 %v2357_v24  ;;  %v2381_v24 = vpack.c.bf16 %v1330_v43, %v1329_v38 }
 0x3c3   :  { %2362 = vmatprep.subr.bf16.mxu1 %v2361_v5 }
 0x3c4   :  { %2382 = vmatprep.subr.bf16.mxu0 %v2381_v24 }
 0x3c5   :  { %2384 = vmatpush3.bf16.msra.mxu0 %v2381_v24  ;;  %v1585_v24 = vld [vmem:[%s3293_s13] ss:$0 sm:$0xff]  ;;  %s1563_s13 = sshll.u32 %s2742_s12, 4  ;;  %s1564_s13 = int_to_ptr.vmem [resolvable:$true] %s1563_s13 }
 0x3c6   :  { %2364 = vmatpush3.bf16.msra.mxu1 %v2361_v5  ;;  %v1334_v5 = vld [vmem:[#allocation13 + $0x68] sm:$0xff]  ;;  %s2693_s23 = scalar_lea.vmem %s1564_s13, 256  ;;  %p2698_p9 = scmp.lt.s32.totalorder %s1564_s13, %s1564_s13 }
 0x3c7   :  { %p2694_p8 = scmp.ne.s32.totalorder %s1564_s13, %s2693_s23  ;;  %p2699_p10 = scmp.lt.s32.totalorder %s2693_s23, %s2693_s23 }
 0x3c9   :  { %p2700_p11 = por %p2699_p10, %p2698_p9 }
 0x3cb   :  { %p2701_p12 = pnand %p2700_p11, %p2694_p8 }
 0x43c   :  { %v1861_v12 = vpop.f32.mrb[6].mxu0 }
 0x43d   :  { %v929_v13 = vpop.f32.mrb[7].mxu0  ;;  %v935_v14 = vadd.f32 %v1861_v12, %v3170_v40 }
 0x43e   :  { %v930_v35 = vadd.f32 %v929_v13, %v3170_v40 }
 0x45b   :  { %v1004_v22 = vpop.f32.mrb[6].mxu1 }
 0x45c   :  { %v2438_v27 = vadd.f32 %v3160_v49, %v1004_v22  ;;  %v1006_v36 = vpop.f32.mrb[7].mxu1  ;;  %v1896_v45 = vpop.f32.mrb[8].mxu0 }
 0x45d   :  { %v1081_v54 = vpop.f32.mrb[9].mxu0  ;;  %v2440_v29 = vadd.f32 %v3164_v39, %v1006_v36  ;;  %v1087_v51 = vadd.f32 %v1896_v45, %v3167_v62 }
 0x45e   :  { %v1092_v63 = vmul.f32 0.5, %v2438_v27  ;;  %v1082_v10 = vadd.f32 %v1081_v54, %v3167_v62 }
 0x45f   :  { %v1010_v15 = vpop.f32.mrb[8].mxu1  ;;  %v1102_v56 = vmul.f32 0.5, %v2440_v29 }
 0x460   :  { %2483 = vtanh.f32 %v1092_v63  ;;  %v2442_v33 = vadd.f32 %v3160_v49, %v1010_v15  ;;  %v1012_v41 = vpop.f32.mrb[9].mxu1  ;;  %v1450_v15 = vld [vmem:[#allocation14 + $0x10] sm:$0xff] }
 0x461   :  { %v2444_v57 = vadd.f32 %v3164_v39, %v1012_v41 }
 0x462   :  { %v1093_v47 = vmul.f32 0.5, %v2442_v33  ;;  %v1451_v33 = vld [vmem:[#allocation14 + $0x18] sm:$0xff] }
 0x463   :  { %v1103_v21 = vmul.f32 0.5, %v2444_v57  ;;  %v1452_v57 = vld [vmem:[#allocation14 + $0x20] sm:$0xff] }
 0x464   :  { %2485 = vtanh.f32 %v1093_v47 }
 0x465   :  { %2487 = vtanh.f32 %v1102_v56  ;;  %v2401_v56 = vpack.c.bf16 %v1451_v33, %v1450_v15 }
 0x466   :  { %2489 = vtanh.f32 %v1103_v21  ;;  %v1455_v21 = vld [vmem:[#allocation14 + $0x38] sm:$0xff] }
 0x46a   :  { %v2484_v0 = vpop.eup %2483 }
 0x46b   :  { %v1096_v61 = vadd.f32 1.0, %v2484_v0  ;;  %v1453_v0 = vld [vmem:[#allocation14 + $0x28] sm:$0xff] }
 0x46d   :  { %v1098_v11 = vmul.f32 0.5, %v1096_v61  ;;  %v2515_v61 = vld [vmem:[#allocation5] sm:$0xff] }
 0x46e   :  { %v2486_v34 = vpop.eup %2485 }
 0x46f   :  { %v1110_v42 = vmul.f32 %v1098_v11, %v1082_v10  ;;  %v1097_v49 = vadd.f32 1.0, %v2486_v34  ;;  %v2488_v30 = vpop.eup %2487  ;;  %v2405_v10 = vpack.c.bf16 %v1453_v0, %v1452_v57  ;;  %v1454_v11 = vld [vmem:[#allocation14 + $0x30] sm:$0xff] }
 0x470   :  { %v1106_v44 = vadd.f32 1.0, %v2488_v30  ;;  %v2490_v48 = vpop.eup %2489  ;;  %v2409_v34 = vpack.c.bf16 %v1455_v21, %v1454_v11  ;;  %v1462_v30 = vld [vmem:[#allocation14 + $0x70] sm:$0xff] }
 0x471   :  { %v1112_v52 = vadd.f32 %v1110_v42, %v930_v35  ;;  %v1099_v60 = vmul.f32 0.5, %v1097_v49  ;;  %v1107_v9 = vadd.f32 1.0, %v2490_v48  ;;  %v1456_v35 = vld [vmem:[#allocation14 + $0x40] sm:$0xff]  ;;  %v1457_v42 = vld [vmem:[#allocation14 + $0x48] sm:$0xff] }
 0x472   :  { %v1108_v6 = vmul.f32 0.5, %v1106_v44  ;;  %v2413_v49 = vpack.c.bf16 %v1457_v42, %v1456_v35  ;;  %v1463_v44 = vld [vmem:[#allocation14 + $0x78] sm:$0xff] }
 0x473   :  { %2491 = vtanh.f32 %v1112_v52  ;;  %v1111_v39 = vmul.f32 %v1099_v60, %v1087_v51  ;;  %v1109_v62 = vmul.f32 0.5, %v1107_v9  ;;  %v1458_v51 = vld [vmem:[#allocation14 + $0x50] sm:$0xff]  ;;  %v1459_v52 = vld [vmem:[#allocation14 + $0x58] sm:$0xff]  ;;  %v2425_v48 = vpack.c.bf16 %v1463_v44, %v1462_v30 }
 0x474   :  { %v2417_v60 = vpack.c.bf16 %v1459_v52, %v1458_v51 }
 0x475   :  { %v1113_v20 = vadd.f32 %v1111_v39, %v935_v14  ;;  %v1460_v14 = vld [vmem:[#allocation14 + $0x60] sm:$0xff]  ;;  %v1461_v39 = vld [vmem:[#allocation14 + $0x68] sm:$0xff] }
 0x477   :  { %2493 = vtanh.f32 %v1113_v20  ;;  %v2421_v20 = vpack.c.bf16 %v1461_v39, %v1460_v14 }
 0x47d   :  { %v2492_v59 = vpop.eup %2491 }
 0x47e   :  { %v1116_v18 = vsub.f32 %v3178_v58, %v2492_v59  ;;  %v1331_v58 = vld [vmem:[#allocation13 + $0x50] sm:$0xff] }
 0x47f   :  { %v2385_v53 = vpack.c.bf16 %v1332_v50, %v1331_v58 }
 0x480   :  { %v1118_v19 = vmul.f32 %v1116_v18, %v1108_v6  ;;  %v1584_v6 = vld [vmem:[%s3290_s10] ss:$0 sm:$0xff] }
 0x481   :  { %v2494_v7 = vpop.eup %2493  ;;  %2386 = vmatprep.subr.bf16.mxu0 %v2385_v53 }
 0x482   :  { %v1117_v31 = vsub.f32 %v3180_v3, %v2494_v7  ;;  %v1120_v26 = vadd.f32 %v2492_v59, %v1118_v19  ;;  %2388 = vmatpush3.bf16.msra.mxu0 %v2385_v53  ;;  %v1333_v3 = vld [vmem:[#allocation13 + $0x60] sm:$0xff]  ;;  %v2516_v59 = vld [vmem:[#allocation5 + $0x8] sm:$0xff] }
 0x483   :  { %v2389_v16 = vpack.c.bf16 %v1334_v5, %v1333_v3 }
 0x484   :  { %v1119_v25 = vmul.f32 %v1117_v31, %v1109_v62  ;;  %1964 = vmatprep.mubr.f32.mxu1 %v1120_v26 }
 0x485   :  { %2390 = vmatprep.subr.bf16.mxu0 %v2389_v16 }
 0x486   :  { %v1121_v40 = vadd.f32 %v2494_v7, %v1119_v25  ;;  %2392 = vmatpush3.bf16.msra.mxu0 %v2389_v16 }
 0x487   :  { %2394 = vmatprep.subr.bf16.mxu0 %v2393_v23 }
 0x488   :  { %1965 = vmatmul.mubr.f32.vlgmr.msra.gmra.mrb[10].mxu1 %v1121_v40 }
 0x48a   :  { %2396 = vmatpush3.bf16.msra.mxu0 %v2393_v23 }
 0x48b   :  { %2398 = vmatprep.subr.bf16.mxu0 %v2397_v4 }
 0x55b   :  { %v1966_v2 = vpop.f32.mrb[10].mxu1 }
 0x55c   :  { %v1312_v12 = vadd.f32 %v1966_v2, %v1583_v17  ;;  %v1295_v13 = vpop.f32.mrb[11].mxu1 }
 0x55d   :  { %v1311_v22 = vadd.f32 %v1583_v17, %v1295_v13 }
 0x55e   :  { %v1314_v27 = vand.u32 2147483647, %v1312_v12 }
 0x55f   :  { %v1313_v36 = vand.u32 2147483647, %v1311_v22 }
 0x560   :  { %v1316_v45 = vadd.f32 1.0, %v1314_v27 }
 0x561   :  { %v1315_v54 = vadd.f32 1.0, %v1313_v36 }
 0x562   :  { %2495 = vrcp.f32 %v1316_v45 }
 0x563   :  { %2497 = vrcp.f32 %v1315_v54 }
 0x56c   :  { %v2496_v63 = vpop.eup %2495 }
 0x56d   :  { %v2498_v41 = vpop.eup %2497  ;;  %v1320_v29 = vmul.f32 %v2496_v63, %v1312_v12 }
 0x56e   :  { %v1319_v47 = vmul.f32 %v2498_v41, %v1311_v22 }
 0x570   :  { %1999 = vmatprep.mubr.f32.mxu0 %v1319_v47 }
 0x571   :  { %2000 = vmatmul.mubr.f32.vlgmr.msra.gmra.mrb[10].mxu0 %v1320_v29 }
 0x572   :  { %2400 = vmatpush3.bf16.msra.mxu0 %v2397_v4  ;;  %2034 = vmatprep.mubr.f32.mxu0 %v2515_v61 }
 0x573   :  { %2402 = vmatprep.subr.bf16.mxu0 %v2401_v56 }
 0x576   :  { %2404 = vmatpush3.bf16.msra.mxu0 %v2401_v56 }
 0x577   :  { %2406 = vmatprep.subr.bf16.mxu0 %v2405_v10 }
 0x57a   :  { %2408 = vmatpush3.bf16.msra.mxu0 %v2405_v10 }
 0x57b   :  { %2410 = vmatprep.subr.bf16.mxu0 %v2409_v34 }
 0x57e   :  { %2412 = vmatpush3.bf16.msra.mxu0 %v2409_v34 }
 0x57f   :  { %2414 = vmatprep.subr.bf16.mxu0 %v2413_v49 }
 0x582   :  { %2416 = vmatpush3.bf16.msra.mxu0 %v2413_v49 }
 0x583   :  { %2418 = vmatprep.subr.bf16.mxu0 %v2417_v60 }
 0x586   :  { %2420 = vmatpush3.bf16.msra.mxu0 %v2417_v60 }
 0x587   :  { %2422 = vmatprep.subr.bf16.mxu0 %v2421_v20 }
 0x58a   :  { %2424 = vmatpush3.bf16.msra.mxu0 %v2421_v20 }
 0x58b   :  { %2426 = vmatprep.subr.bf16.mxu0 %v2425_v48 }
 0x58e   :  { %2428 = vmatpush3.bf16.msra.mxu0 %v2425_v48 }
 0x591   :  { %2035 = vmatmul.mubr.f32.vlgmr.msra.gmra.mrb[12].mxu0 %v2516_v59 }
 0x644   :  { %v2001_v9 = vpop.f32.mrb[10].mxu0 }
 0x645   :  { %v1416_v18 = vadd.f32 %v2001_v9, %v1584_v6  ;;  %v1410_v19 = vpop.f32.mrb[11].mxu0 }
 0x646   :  { %v1411_v7 = vadd.f32 %v1584_v6, %v1410_v19 }
 0x647   :  { %v1420_v62 = vand.u32 2147483647, %v1416_v18 }
 0x648   :  { %v1419_v31 = vand.u32 2147483647, %v1411_v7 }
 0x649   :  { %v1422_v26 = vadd.f32 1.0, %v1420_v62 }
 0x64a   :  { %v1421_v25 = vadd.f32 1.0, %v1419_v31 }
 0x64b   :  { %2499 = vrcp.f32 %v1422_v26 }
 0x64c   :  { %2501 = vrcp.f32 %v1421_v25 }
 0x655   :  { %v2500_v40 = vpop.eup %2499 }
 0x656   :  { %v2502_v1 = vpop.eup %2501  ;;  %v1426_v32 = vmul.f32 %v2500_v40, %v1416_v18 }
 0x657   :  { %v1425_v37 = vmul.f32 %v2502_v1, %v1411_v7 }
 0x658   :  { %v1429_v38 = vmul.f32 1.442695, %v1426_v32 }
 0x659   :  { %v1427_v43 = vmul.f32 1.442695, %v1425_v37 }
 0x65b   :  { %2503 = vpow2.f32 %v1427_v43 }
 0x65c   :  { %2505 = vpow2.f32 %v1429_v38 }
 0x664   :  { %v2036_v58 = vpop.f32.mrb[12].mxu0 }
 0x665   :  { %v2504_v50 = vpop.eup %2503  ;;  %v1537_v53 = vpop.f32.mrb[13].mxu0  ;;  %v1543_v23 = vadd.f32 %v2036_v58, %v1586_v8 }
 0x666   :  { %v1438_v3 = vmul.f32 %v2504_v50, %v1585_v24  ;;  %v2506_v5 = vpop.eup %2505  ;;  %v1538_v28 = vadd.f32 %v1586_v8, %v1537_v53 }
 0x667   :  { %v1439_v16 = vmul.f32 %v2506_v5, %v1585_v24  ;;  %v1547_v55 = vand.u32 2147483647, %v1543_v23 }
 0x668   :  { %1440 = vadd.xlane.f32.xlu0 %v1438_v3  ;;  %v1546_v46 = vand.u32 2147483647, %v1538_v28 }
 0x669   :  { %v1549_v17 = vadd.f32 1.0, %v1547_v55 }
 0x66a   :  { %v1548_v4 = vadd.f32 1.0, %v1546_v46 }
 0x66c   :  { %1442 = vadd.xlane.f32.xlu0 %v1439_v16  ;;  %2507 = vrcp.f32 %v1548_v4 }
 0x676   :  { %v2508_v13 = vpop.eup %2507 }
 0x677   :  { %v1552_v27 = vmul.f32 %v2508_v13, %v1538_v28 }
 0x6f5   :  { %v1441_v2 = vpop.xlane.xlu0 %1440 }
 0x6f6   :  { %2509 = vrcp.f32 %v1441_v2 }
 0x6f7   :  { %2511 = vrcp.f32 %v1549_v17 }
 0x6f9   :  { %v1443_v12 = vpop.xlane.xlu0 %1442 }
 0x6fa   :  { %2513 = vrcp.f32 %v1443_v12 }
 0x700   :  { %v2510_v22 = vpop.eup %2509 }
 0x701   :  { %v1446_v36 = vmul.f32 %v2510_v22, %v1438_v3  ;;  %v2512_v45 = vpop.eup %2511 }
 0x702   :  { %v1553_v15 = vmul.f32 %v2512_v45, %v1543_v23 }
 0x703   :  { %v1554_v54 = vmul.f32 %v1552_v27, %v1446_v36 }
 0x704   :  { %v2514_v63 = vpop.eup %2513 }
 0x705   :  { %v1447_v33 = vmul.f32 %v2514_v63, %v1439_v16  ;;  %1556 = vst [vmem:[#allocation16] sm:$0xff] %v1554_v54 }
 0x707   :  { %v1555_v41 = vmul.f32 %v1553_v15, %v1447_v33 }
 0x709   :  { %1557 = vst [vmem:[#allocation16 + $0x8] sm:$0xff] %v1555_v41 }
 0x70a   :  { %2704 = shalt.err (!%p2701_p12)
}
 0x70b   :  { %s2705_s3 = scalar_lea.hbm %s3294_s14, 256 }
 0x70c   :  { %p2706_p13 = scmp.ne.s32.totalorder %s3294_s14, %s2705_s3  ;;  %p2709_p0 = scmp.lt.u32.totalorder %s2705_s3, %s3294_s14 }
 0x70e   :  { %p2711_p1 = pnand %p2709_p0, %p2706_p13 }
 0x710   :  { %2714 = shalt.err (!%p2711_p1)
}
 0x711   :  { %1569 = dma.vmem_to_hbm [thread:$0]  %s1564_s13, 256, %s3294_s14, [#allocation4], %s3297_s2, %s3297_s2, %s2729_s24  }
 0x712   :  { %2725 = dma.done.wait [#allocation4], 256  }
 0x713   :  { %2726 = vsyncadd [#allocation4], 4294967040 }
 0x714   :  { %1573 = vsyncpa [#allocation3], 1 }
 0x715   :  { %1574 = vsyncpa [#allocation6], 1 }
 0x716   :  { %1575 = vsyncpa [#allocation9], 1 }
 0x717   :  { %1576 = vsyncpa [#allocation12], 1 }
 0x718   :  { %1577 = vsyncpa [#allocation15], 1 }
 0x719   :  { %1578 = vsyncpa [#allocation4], 1 }

</bundles_post_ra>
